<compile_context>
chip_gen: v6e
topology: v6e:2x2x1
jax: 0.10.0
libtpu: 0.0.40
codegen_flags: <defaults>
</compile_context>

<pallas_src>
import functools

import jax
import jax.numpy as jnp
import numpy as np
from jax.experimental import pallas as pl
from jax.experimental.pallas import tpu as pltpu


# ---------------------------------------------------------------------------
# Pallas kernel: one batch element per grid step
# ---------------------------------------------------------------------------
def _decoder_layer_kernel(xq_ref, xkv_ref, xm_ref, xp_ref, w_ref, vec_ref,
                          out_ref, *, nhead, hd, E, dff, Lq, Lkv, Lm,
                          w_layout, v_layout):
    bf16 = jnp.bfloat16

    def W(name):
        r, rin, rout = w_layout[name]
        return w_ref[r:r + rin, 0:rout]           # bf16, pre-transposed

    def V(name):
        r, w = v_layout[name]
        return vec_ref[r:r + 1, 0:w]              # (1, w) f32

    def mm(x, wname):
        # bf16 operands on the MXU, f32 accumulation.
        return jnp.dot(x.astype(bf16), W(wname),
                       preferred_element_type=jnp.float32)

    def layernorm(x, gname, bname, eps=1e-5):
        mu = jnp.mean(x, axis=-1, keepdims=True)
        var = jnp.mean(jnp.square(x - mu), axis=-1, keepdims=True)
        return (x - mu) * jax.lax.rsqrt(var + eps) * V(gname) + V(bname)

    def split_heads(x2):                          # (L, E) -> (nhead, L, hd)
        return jnp.stack([x2[:, h * hd:(h + 1) * hd] for h in range(nhead)],
                         axis=0)

    def attention(q2, k2, v2, wo_name, bo_name):
        """q2: (Lq, E) already scaled (scale folded in weights);
        k2/v2: (Lk, E).  Head-batched einsums + one output projection."""
        qh = split_heads(q2)                      # (H, Lq, hd)
        kh = split_heads(k2)                      # (H, Lk, hd)
        vh = split_heads(v2)                      # (H, Lk, hd)
        s = jnp.einsum('hqd,hkd->hqk', qh.astype(bf16), kh.astype(bf16),
                       preferred_element_type=jnp.float32)
        s = s - jnp.max(s, axis=-1, keepdims=True)
        p = jnp.exp(s)
        p = p * pl.reciprocal(jnp.sum(p, axis=-1, keepdims=True), approx=True)
        o = jnp.einsum('hqk,hkd->hqd', p.astype(bf16), vh.astype(bf16),
                       preferred_element_type=jnp.float32)   # (H, Lq, hd)
        o2 = jnp.concatenate([o[h] for h in range(nhead)], axis=-1)  # (Lq, E)
        return (jnp.dot(o2.astype(bf16), W(wo_name),
                        preferred_element_type=jnp.float32) + V(bo_name))

    x_q = xq_ref[...]     # (Lq, E)  f32
    x_kv = xkv_ref[...]   # (Lkv, E)
    x_m = xm_ref[...]     # (Lm, E)
    x_p = xp_ref[...]     # (Lm, E)

    # ---- self attention + residual + norm1 ----
    q2 = mm(x_q, "sa_q") + V("sa_bq")             # scale folded into sa_q
    k2 = mm(x_kv, "sa_k") + V("sa_bk")
    v2 = mm(x_kv, "sa_v") + V("sa_bv")
    sa = attention(q2, k2, v2, "sa_o", "sa_bo")
    t = layernorm(x_q + sa, "n1w", "n1b")

    # ---- cross attention (key = memory + pos, value = memory) ----
    qc = mm(t, "ca_q") + V("ca_bq")               # scale folded into ca_q
    kc = mm(x_m + x_p, "ca_k") + V("ca_bk")
    vc = mm(x_m, "ca_v") + V("ca_bv")
    ca = attention(qc, kc, vc, "ca_o", "ca_bo")
    t = layernorm(t + ca, "n2w", "n2b")

    # ---- feed-forward (relu) + residual + norm3 ----
    hmid = jnp.maximum(mm(t, "w1") + V("b1"), 0.0)
    f = mm(hmid, "w2") + V("b2")
    t = layernorm(t + f, "n3w", "n3b")

    out_ref[...] = t


# ---------------------------------------------------------------------------
# one-time parameter packing (runs at layer-build time, NOT per forward call)
# ---------------------------------------------------------------------------
def _pack_params(params, nhead):
    E = params["sa_ow"].shape[0]
    dff = params["w1"].shape[0]
    hd = E // nhead
    scale = 1.0 / float(hd) ** 0.5

    def T(a):  # (out, in) -> (in, out): no transposes inside the kernel
        return jnp.asarray(a, jnp.float32).T

    w_parts = [
        ("sa_q", T(params["sa_w"][0:E]) * scale),       # scale folded in
        ("sa_k", T(params["sa_w"][E:2 * E])),
        ("sa_v", T(params["sa_w"][2 * E:3 * E])),
        ("sa_o", T(params["sa_ow"])),
        ("ca_q", T(params["ca_w"][0:E]) * scale),       # scale folded in
        ("ca_k", T(params["ca_w"][E:2 * E])),
        ("ca_v", T(params["ca_w"][2 * E:3 * E])),
        ("ca_o", T(params["ca_ow"])),
        ("w1",   T(params["w1"])),                      # (E, dff)
        ("w2",   T(params["w2"])),                      # (dff, E)
    ]
    cmax = max(128, max(a.shape[1] for _, a in w_parts))   # lane-pad to 128
    w_layout, rows, r = {}, [], 0
    for name, a in w_parts:
        w_layout[name] = (r, a.shape[0], a.shape[1])
        rows.append(jnp.pad(a, ((0, 0), (0, cmax - a.shape[1]))))
        r += a.shape[0]
    w_slab = jnp.concatenate(rows, axis=0).astype(jnp.bfloat16)

    v_parts = [
        ("sa_bq", params["sa_b"][0, 0:E] * scale),
        ("sa_bk", params["sa_b"][0, E:2 * E]),
        ("sa_bv", params["sa_b"][0, 2 * E:3 * E]),
        ("sa_bo", params["sa_ob"][0]),
        ("ca_bq", params["ca_b"][0, 0:E] * scale),
        ("ca_bk", params["ca_b"][0, E:2 * E]),
        ("ca_bv", params["ca_b"][0, 2 * E:3 * E]),
        ("ca_bo", params["ca_ob"][0]),
        ("b1",    params["b1"][0]),
        ("b2",    params["b2"][0]),
        ("n1w",   params["n1w"][0]), ("n1b", params["n1b"][0]),
        ("n2w",   params["n2w"][0]), ("n2b", params["n2b"][0]),
        ("n3w",   params["n3w"][0]), ("n3b", params["n3b"][0]),
    ]
    vmax = max(128, max(v.shape[0] for _, v in v_parts))
    v_layout, vrows = {}, []
    for i, (name, v) in enumerate(v_parts):
        v_layout[name] = (i, v.shape[0])
        vrows.append(jnp.pad(jnp.asarray(v, jnp.float32),
                             (0, vmax - v.shape[0]))[None, :])
    vec_slab = jnp.concatenate(vrows, axis=0)           # f32 (elementwise path)
    return w_slab, vec_slab, w_layout, v_layout, E, dff, hd


def make_transformer_decoder_layer(params, nhead):
    """Pack parameters once; return a jitted apply(tgt_q, tgt_kv, memory, pos)."""
    w_slab, vec_slab, w_layout, v_layout, E, dff, hd = _pack_params(params, nhead)

    @jax.jit
    def apply(tgt_q, tgt_kv, memory, pos):
        N, Lq, _ = tgt_q.shape
        _, Lkv, _ = tgt_kv.shape
        _, Lm, _ = memory.shape

        x_q = tgt_q.reshape(N * Lq, E).astype(jnp.float32)
        x_kv = tgt_kv.reshape(N * Lkv, E).astype(jnp.float32)
        x_m = memory.reshape(N * Lm, E).astype(jnp.float32)
        x_p = pos.reshape(N * Lm, E).astype(jnp.float32)

        kernel = functools.partial(
            _decoder_layer_kernel, nhead=nhead, hd=hd, E=E, dff=dff,
            Lq=Lq, Lkv=Lkv, Lm=Lm, w_layout=w_layout, v_layout=v_layout)

        grid_spec = pl.GridSpec(
            grid=(N,),                                     # one batch / step
            in_specs=[
                pl.BlockSpec((Lq, E), lambda b: (b, 0)),
                pl.BlockSpec((Lkv, E), lambda b: (b, 0)),
                pl.BlockSpec((Lm, E), lambda b: (b, 0)),
                pl.BlockSpec((Lm, E), lambda b: (b, 0)),
                pl.BlockSpec(w_slab.shape, lambda b: (0, 0)),   # resident
                pl.BlockSpec(vec_slab.shape, lambda b: (0, 0)),  # resident
            ],
            out_specs=pl.BlockSpec((Lq, E), lambda b: (b, 0)),
        )

        out2d = pl.pallas_call(
            kernel,
            out_shape=jax.ShapeDtypeStruct((N * Lq, E), jnp.float32),
            grid_spec=grid_spec,
            compiler_params=pltpu.CompilerParams(
                dimension_semantics=("parallel",),   # v7x: shard batches on 2 TCs
                vmem_limit_bytes=64 * 1024 * 1024),
        )(x_q, x_kv, x_m, x_p, w_slab, vec_slab)

        # forward_post returns [tgt, tgt_all[1]]
        return out2d.reshape(N, Lq, E), tgt_kv

    return apply


# ---------------------------------------------------------------------------
# pure-JAX reference (PyTorch MultiheadAttention semantics) for verification
# ---------------------------------------------------------------------------
def reference_layer(tgt_q, tgt_kv, memory, pos, p, nhead):
    E = tgt_q.shape[-1]
    hd = E // nhead
    scale = 1.0 / float(hd) ** 0.5

    def mha(q_in, k_in, v_in, w_in, b_in, w_out, b_out):
        wq, wk, wv = w_in[0:E], w_in[E:2 * E], w_in[2 * E:3 * E]
        bq, bk, bv = b_in[0, 0:E], b_in[0, E:2 * E], b_in[0, 2 * E:3 * E]
        q = (q_in @ wq.T + bq) * scale
        k = k_in @ wk.T + bk
        v = v_in @ wv.T + bv
        lq, lk = q_in.shape[0], k_in.shape[0]
        qh = q.reshape(lq, nhead, hd).transpose(1, 0, 2)
        kh = k.reshape(lk, nhead, hd).transpose(1, 0, 2)
        vh = v.reshape(lk, nhead, hd).transpose(1, 0, 2)
        s = jnp.einsum('hqd,hkd->hqk', qh, kh)
        pr = jax.nn.softmax(s, axis=-1)
        o = jnp.einsum('hqk,hkd->hqd', pr, vh).transpose(1, 0, 2).reshape(lq, E)
        return o @ w_out.T + b_out[0]

    def ln(x, g, b):
        mu = x.mean(-1, keepdims=True)
        var = ((x - mu) ** 2).mean(-1, keepdims=True)
        return (x - mu) * jax.lax.rsqrt(var + 1e-5) * g + b

    def one(bq_, bkv, bm, bp):
        sa = mha(bq_, bkv, bkv, p["sa_w"], p["sa_b"], p["sa_ow"], p["sa_ob"])
        t = ln(bq_ + sa, p["n1w"][0], p["n1b"][0])
        ca = mha(t, bm + bp, bm, p["ca_w"], p["ca_b"], p["ca_ow"], p["ca_ob"])
        t = ln(t + ca, p["n2w"][0], p["n2b"][0])
        h = jnp.maximum(t @ p["w1"].T + p["b1"][0], 0.0)
        f = h @ p["w2"].T + p["b2"][0]
        return ln(t + f, p["n3w"][0], p["n3b"][0])

    return jax.vmap(one)(tgt_q, tgt_kv, memory, pos)


# ---------------------------------------------------------------------------
if __name__ == "__main__":
    d_model, nhead, dim_ff = 32, 4, 64
    N, Lq, Lkv, Lm = 2, 8, 8, 16

    key = jax.random.PRNGKey(0)
    keys = jax.random.split(key, 24)
    ki = iter(keys)

    def init(shape, scale=0.05):
        return jax.random.normal(next(ki), shape, jnp.float32) * scale

    # Deterministic synthetic parameters (shapes follow nn.MultiheadAttention /
    # nn.Linear / nn.LayerNorm in the module's __init__). Biases are (1, D).
    params = {
        "sa_w": init((3 * d_model, d_model)),
        "sa_b": init((1, 3 * d_model)),
        "sa_ow": init((d_model, d_model)),
        "sa_ob": init((1, d_model)),
        "ca_w": init((3 * d_model, d_model)),
        "ca_b": init((1, 3 * d_model)),
        "ca_ow": init((d_model, d_model)),
        "ca_ob": init((1, d_model)),
        "w1": init((dim_ff, d_model)),
        "b1": init((1, dim_ff)),
        "w2": init((d_model, dim_ff)),
        "b2": init((1, d_model)),
        "n1w": jnp.ones((1, d_model), jnp.float32),
        "n1b": jnp.zeros((1, d_model), jnp.float32),
        "n2w": jnp.ones((1, d_model), jnp.float32),
        "n2b": jnp.zeros((1, d_model), jnp.float32),
        "n3w": jnp.ones((1, d_model), jnp.float32),
        "n3b": jnp.zeros((1, d_model), jnp.float32),
    }

    # PyTorch-style sequence-first inputs (L, N, E) ...
    tgt_q_sf = jax.random.normal(next(ki), (Lq, N, d_model), jnp.float32)
    tgt_kv_sf = jax.random.normal(next(ki), (Lkv, N, d_model), jnp.float32)
    memory_sf = jax.random.normal(next(ki), (Lm, N, d_model), jnp.float32)
    pos_sf = jax.random.normal(next(ki), (Lm, N, d_model), jnp.float32)

    # ... transposed once into batch-first layout (N, L, E).
    tgt_q = jnp.transpose(tgt_q_sf, (1, 0, 2))
    tgt_kv = jnp.transpose(tgt_kv_sf, (1, 0, 2))
    memory = jnp.transpose(memory_sf, (1, 0, 2))
    pos = jnp.transpose(pos_sf, (1, 0, 2))

    # Parameters packed ONCE, outside the per-call path.
    decoder_layer = make_transformer_decoder_layer(params, nhead)

    out, passthrough = decoder_layer(tgt_q, tgt_kv, memory, pos)
    out = jax.block_until_ready(out)

    ref = reference_layer(tgt_q, tgt_kv, memory, pos, params, nhead)
    ref = jax.block_until_ready(ref)

    # Tolerance covers bf16 matmul operands (f32 accumulation / residuals /
    # layernorm stats) and pl.reciprocal(approx=True) in the softmax.
    np.testing.assert_allclose(np.asarray(out), np.asarray(ref),
                               rtol=2e-2, atol=2e-2)
    # second returned value of forward_post is tgt_all[1] passed through untouched
    np.testing.assert_allclose(np.asarray(passthrough), np.asarray(tgt_kv))

    print("KERNEL_OK")
</pallas_src>

<mosaic_0001>
module attributes {stable_mosaic.version = 11 : i64} {
  func.func @_decoder_layer_kernel(%arg0: i32, %arg1: memref<8x32xf32, #tpu.memory_space<vmem>>, %arg2: memref<8x32xf32, #tpu.memory_space<vmem>>, %arg3: memref<16x32xf32, #tpu.memory_space<vmem>>, %arg4: memref<16x32xf32, #tpu.memory_space<vmem>>, %arg5: memref<352x128xbf16, #tpu.memory_space<vmem>>, %arg6: memref<16x128xf32, #tpu.memory_space<vmem>>, %arg7: memref<8x32xf32, #tpu.memory_space<vmem>>) attributes {dimension_semantics = [#tpu.dimension_semantics<parallel>], iteration_bounds = array<i64: 2>, scalar_prefetch = 0 : i64, scratch_operands = 0 : i64, tpu.core_type = #tpu.core_type<tc>, window_params = [{transform_indices = @transform_0, window_bounds = array<i64: 8, 32>}, {transform_indices = @transform_1, window_bounds = array<i64: 8, 32>}, {transform_indices = @transform_2, window_bounds = array<i64: 16, 32>}, {transform_indices = @transform_3, window_bounds = array<i64: 16, 32>}, {pipeline_mode = #tpu.pipeline_mode<synchronous>, transform_indices = @transform_4, window_bounds = array<i64: 352, 128>}, {pipeline_mode = #tpu.pipeline_mode<synchronous>, transform_indices = @transform_5, window_bounds = array<i64: 16, 128>}, {transform_indices = @transform_6, window_bounds = array<i64: 8, 32>}]} {
    %c0 = arith.constant 0 : index
    %c0_0 = arith.constant 0 : index
    %0 = vector.load %arg1[%c0, %c0_0] : memref<8x32xf32, #tpu.memory_space<vmem>>, vector<8x32xf32>
    %c0_1 = arith.constant 0 : index
    %c0_2 = arith.constant 0 : index
    %1 = vector.load %arg2[%c0_1, %c0_2] : memref<8x32xf32, #tpu.memory_space<vmem>>, vector<8x32xf32>
    %c0_3 = arith.constant 0 : index
    %c0_4 = arith.constant 0 : index
    %2 = vector.load %arg3[%c0_3, %c0_4] : memref<16x32xf32, #tpu.memory_space<vmem>>, vector<16x32xf32>
    %c0_5 = arith.constant 0 : index
    %c0_6 = arith.constant 0 : index
    %3 = vector.load %arg4[%c0_5, %c0_6] : memref<16x32xf32, #tpu.memory_space<vmem>>, vector<16x32xf32>
    %4 = arith.truncf %0 : vector<8x32xf32> to vector<8x32xbf16>
    %c0_7 = arith.constant 0 : index
    %c0_8 = arith.constant 0 : index
    %5 = vector.load %arg5[%c0_7, %c0_8] : memref<352x128xbf16, #tpu.memory_space<vmem>>, vector<32x32xbf16>
    %cst = arith.constant dense<0.000000e+00> : vector<8x32xf32>
    %6 = tpu.matmul %4, %5, %cst {dimension_numbers = #tpu.dot_dimension_numbers<[1], [0], [0], [1], [0, 0, 1, 1], [], []>} : vector<8x32xbf16>, vector<32x32xbf16>, vector<8x32xf32> -> vector<8x32xf32>
    %c0_9 = arith.constant 0 : index
    %c0_10 = arith.constant 0 : index
    %7 = vector.load %arg6[%c0_9, %c0_10] : memref<16x128xf32, #tpu.memory_space<vmem>>, vector<1x32xf32>
    %8 = vector.broadcast %7 : vector<1x32xf32> to vector<8x32xf32>
    %9 = arith.addf %6, %8 : vector<8x32xf32>
    %10 = arith.truncf %1 : vector<8x32xf32> to vector<8x32xbf16>
    %c32 = arith.constant 32 : index
    %c0_11 = arith.constant 0 : index
    %11 = vector.load %arg5[%c32, %c0_11] : memref<352x128xbf16, #tpu.memory_space<vmem>>, vector<32x32xbf16>
    %cst_12 = arith.constant dense<0.000000e+00> : vector<8x32xf32>
    %12 = tpu.matmul %10, %11, %cst_12 {dimension_numbers = #tpu.dot_dimension_numbers<[1], [0], [0], [1], [0, 0, 1, 1], [], []>} : vector<8x32xbf16>, vector<32x32xbf16>, vector<8x32xf32> -> vector<8x32xf32>
    %c1 = arith.constant 1 : index
    %c0_13 = arith.constant 0 : index
    %13 = vector.load %arg6[%c1, %c0_13] : memref<16x128xf32, #tpu.memory_space<vmem>>, vector<1x32xf32>
    %14 = vector.broadcast %13 : vector<1x32xf32> to vector<8x32xf32>
    %15 = arith.addf %12, %14 : vector<8x32xf32>
    %16 = arith.truncf %1 : vector<8x32xf32> to vector<8x32xbf16>
    %c64 = arith.constant 64 : index
    %c0_14 = arith.constant 0 : index
    %17 = vector.load %arg5[%c64, %c0_14] : memref<352x128xbf16, #tpu.memory_space<vmem>>, vector<32x32xbf16>
    %cst_15 = arith.constant dense<0.000000e+00> : vector<8x32xf32>
    %18 = tpu.matmul %16, %17, %cst_15 {dimension_numbers = #tpu.dot_dimension_numbers<[1], [0], [0], [1], [0, 0, 1, 1], [], []>} : vector<8x32xbf16>, vector<32x32xbf16>, vector<8x32xf32> -> vector<8x32xf32>
    %c2 = arith.constant 2 : index
    %c0_16 = arith.constant 0 : index
    %19 = vector.load %arg6[%c2, %c0_16] : memref<16x128xf32, #tpu.memory_space<vmem>>, vector<1x32xf32>
    %20 = vector.broadcast %19 : vector<1x32xf32> to vector<8x32xf32>
    %21 = arith.addf %18, %20 : vector<8x32xf32>
    %22 = vector.extract_strided_slice %9 {offsets = [0, 0], sizes = [8, 8], strides = [1, 1]} : vector<8x32xf32> to vector<8x8xf32>
    %23 = vector.extract_strided_slice %9 {offsets = [0, 8], sizes = [8, 8], strides = [1, 1]} : vector<8x32xf32> to vector<8x8xf32>
    %24 = vector.extract_strided_slice %9 {offsets = [0, 16], sizes = [8, 8], strides = [1, 1]} : vector<8x32xf32> to vector<8x8xf32>
    %25 = vector.extract_strided_slice %9 {offsets = [0, 24], sizes = [8, 8], strides = [1, 1]} : vector<8x32xf32> to vector<8x8xf32>
    %26 = vector.shape_cast %22 : vector<8x8xf32> to vector<1x8x8xf32>
    %27 = vector.shape_cast %23 : vector<8x8xf32> to vector<1x8x8xf32>
    %28 = vector.shape_cast %24 : vector<8x8xf32> to vector<1x8x8xf32>
    %29 = vector.shape_cast %25 : vector<8x8xf32> to vector<1x8x8xf32>
    %30 = tpu.concatenate %26, %27, %28, %29 in 0 : vector<1x8x8xf32>, vector<1x8x8xf32>, vector<1x8x8xf32>, vector<1x8x8xf32> -> vector<4x8x8xf32>
    %31 = vector.extract_strided_slice %15 {offsets = [0, 0], sizes = [8, 8], strides = [1, 1]} : vector<8x32xf32> to vector<8x8xf32>
    %32 = vector.extract_strided_slice %15 {offsets = [0, 8], sizes = [8, 8], strides = [1, 1]} : vector<8x32xf32> to vector<8x8xf32>
    %33 = vector.extract_strided_slice %15 {offsets = [0, 16], sizes = [8, 8], strides = [1, 1]} : vector<8x32xf32> to vector<8x8xf32>
    %34 = vector.extract_strided_slice %15 {offsets = [0, 24], sizes = [8, 8], strides = [1, 1]} : vector<8x32xf32> to vector<8x8xf32>
    %35 = vector.shape_cast %31 : vector<8x8xf32> to vector<1x8x8xf32>
    %36 = vector.shape_cast %32 : vector<8x8xf32> to vector<1x8x8xf32>
    %37 = vector.shape_cast %33 : vector<8x8xf32> to vector<1x8x8xf32>
    %38 = vector.shape_cast %34 : vector<8x8xf32> to vector<1x8x8xf32>
    %39 = tpu.concatenate %35, %36, %37, %38 in 0 : vector<1x8x8xf32>, vector<1x8x8xf32>, vector<1x8x8xf32>, vector<1x8x8xf32> -> vector<4x8x8xf32>
    %40 = vector.extract_strided_slice %21 {offsets = [0, 0], sizes = [8, 8], strides = [1, 1]} : vector<8x32xf32> to vector<8x8xf32>
    %41 = vector.extract_strided_slice %21 {offsets = [0, 8], sizes = [8, 8], strides = [1, 1]} : vector<8x32xf32> to vector<8x8xf32>
    %42 = vector.extract_strided_slice %21 {offsets = [0, 16], sizes = [8, 8], strides = [1, 1]} : vector<8x32xf32> to vector<8x8xf32>
    %43 = vector.extract_strided_slice %21 {offsets = [0, 24], sizes = [8, 8], strides = [1, 1]} : vector<8x32xf32> to vector<8x8xf32>
    %44 = vector.shape_cast %40 : vector<8x8xf32> to vector<1x8x8xf32>
    %45 = vector.shape_cast %41 : vector<8x8xf32> to vector<1x8x8xf32>
    %46 = vector.shape_cast %42 : vector<8x8xf32> to vector<1x8x8xf32>
    %47 = vector.shape_cast %43 : vector<8x8xf32> to vector<1x8x8xf32>
    %48 = tpu.concatenate %44, %45, %46, %47 in 0 : vector<1x8x8xf32>, vector<1x8x8xf32>, vector<1x8x8xf32>, vector<1x8x8xf32> -> vector<4x8x8xf32>
    %49 = arith.truncf %30 : vector<4x8x8xf32> to vector<4x8x8xbf16>
    %50 = arith.truncf %39 : vector<4x8x8xf32> to vector<4x8x8xbf16>
    "tpu.trace_start"() <{level = 10 : i32, message = "hqd,hkd->hqk"}> : () -> ()
    %cst_17 = arith.constant dense<0.000000e+00> : vector<4x8x8xf32>
    %51 = tpu.matmul %49, %50, %cst_17 {dimension_numbers = #tpu.dot_dimension_numbers<[2], [2], [1], [1], [0, 0, 0, 1, 1, 1], [0], [0]>} : vector<4x8x8xbf16>, vector<4x8x8xbf16>, vector<4x8x8xf32> -> vector<4x8x8xf32>
    "tpu.trace_stop"() : () -> ()
    %cst_18 = arith.constant dense<0xFF800000> : vector<4x8xf32>
    %52 = vector.multi_reduction <maximumf>, %51, %cst_18 [2] : vector<4x8x8xf32> to vector<4x8xf32>
    %53 = vector.shape_cast %52 : vector<4x8xf32> to vector<4x8x1xf32>
    %54 = vector.broadcast %53 : vector<4x8x1xf32> to vector<4x8x8xf32>
    %55 = arith.subf %51, %54 : vector<4x8x8xf32>
    %56 = math.exp %55 : vector<4x8x8xf32>
    %cst_19 = arith.constant dense<0.000000e+00> : vector<4x8xf32>
    %57 = vector.multi_reduction <add>, %56, %cst_19 [2] : vector<4x8x8xf32> to vector<4x8xf32>
    %58 = vector.shape_cast %57 : vector<4x8xf32> to vector<4x8x1xf32>
    %59 = tpu.reciprocal %58 {approx = true} : vector<4x8x1xf32> -> vector<4x8x1xf32>
    %60 = vector.broadcast %59 : vector<4x8x1xf32> to vector<4x8x8xf32>
    %61 = arith.mulf %56, %60 : vector<4x8x8xf32>
    %62 = arith.truncf %61 : vector<4x8x8xf32> to vector<4x8x8xbf16>
    %63 = arith.truncf %48 : vector<4x8x8xf32> to vector<4x8x8xbf16>
    "tpu.trace_start"() <{level = 10 : i32, message = "hqk,hkd->hqd"}> : () -> ()
    %cst_20 = arith.constant dense<0.000000e+00> : vector<4x8x8xf32>
    %64 = tpu.matmul %62, %63, %cst_20 {dimension_numbers = #tpu.dot_dimension_numbers<[2], [1], [1], [2], [0, 0, 0, 1, 1, 2], [0], [0]>} : vector<4x8x8xbf16>, vector<4x8x8xbf16>, vector<4x8x8xf32> -> vector<4x8x8xf32>
    "tpu.trace_stop"() : () -> ()
    %65 = vector.extract_strided_slice %64 {offsets = [0, 0, 0], sizes = [1, 8, 8], strides = [1, 1, 1]} : vector<4x8x8xf32> to vector<1x8x8xf32>
    %66 = vector.shape_cast %65 : vector<1x8x8xf32> to vector<8x8xf32>
    %67 = vector.extract_strided_slice %64 {offsets = [1, 0, 0], sizes = [1, 8, 8], strides = [1, 1, 1]} : vector<4x8x8xf32> to vector<1x8x8xf32>
    %68 = vector.shape_cast %67 : vector<1x8x8xf32> to vector<8x8xf32>
    %69 = vector.extract_strided_slice %64 {offsets = [2, 0, 0], sizes = [1, 8, 8], strides = [1, 1, 1]} : vector<4x8x8xf32> to vector<1x8x8xf32>
    %70 = vector.shape_cast %69 : vector<1x8x8xf32> to vector<8x8xf32>
    %71 = vector.extract_strided_slice %64 {offsets = [3, 0, 0], sizes = [1, 8, 8], strides = [1, 1, 1]} : vector<4x8x8xf32> to vector<1x8x8xf32>
    %72 = vector.shape_cast %71 : vector<1x8x8xf32> to vector<8x8xf32>
    %73 = tpu.concatenate %66, %68, %70, %72 in 1 : vector<8x8xf32>, vector<8x8xf32>, vector<8x8xf32>, vector<8x8xf32> -> vector<8x32xf32>
    %74 = arith.truncf %73 : vector<8x32xf32> to vector<8x32xbf16>
    %c96 = arith.constant 96 : index
    %c0_21 = arith.constant 0 : index
    %75 = vector.load %arg5[%c96, %c0_21] : memref<352x128xbf16, #tpu.memory_space<vmem>>, vector<32x32xbf16>
    %cst_22 = arith.constant dense<0.000000e+00> : vector<8x32xf32>
    %76 = tpu.matmul %74, %75, %cst_22 {dimension_numbers = #tpu.dot_dimension_numbers<[1], [0], [0], [1], [0, 0, 1, 1], [], []>} : vector<8x32xbf16>, vector<32x32xbf16>, vector<8x32xf32> -> vector<8x32xf32>
    %c3 = arith.constant 3 : index
    %c0_23 = arith.constant 0 : index
    %77 = vector.load %arg6[%c3, %c0_23] : memref<16x128xf32, #tpu.memory_space<vmem>>, vector<1x32xf32>
    %78 = vector.broadcast %77 : vector<1x32xf32> to vector<8x32xf32>
    %79 = arith.addf %76, %78 : vector<8x32xf32>
    %80 = arith.addf %0, %79 : vector<8x32xf32>
    %cst_24 = arith.constant dense<0.000000e+00> : vector<8xf32>
    %81 = vector.multi_reduction <add>, %80, %cst_24 [1] : vector<8x32xf32> to vector<8xf32>
    %82 = vector.shape_cast %81 : vector<8xf32> to vector<8x1xf32>
    %cst_25 = arith.constant 3.200000e+01 : f32
    %83 = vector.broadcast %cst_25 : f32 to vector<8x1xf32>
    %84 = arith.divf %82, %83 : vector<8x1xf32>
    %85 = vector.broadcast %84 : vector<8x1xf32> to vector<8x32xf32>
    %86 = arith.subf %80, %85 : vector<8x32xf32>
    %87 = arith.mulf %86, %86 : vector<8x32xf32>
    %cst_26 = arith.constant dense<0.000000e+00> : vector<8xf32>
    %88 = vector.multi_reduction <add>, %87, %cst_26 [1] : vector<8x32xf32> to vector<8xf32>
    %89 = vector.shape_cast %88 : vector<8xf32> to vector<8x1xf32>
    %cst_27 = arith.constant 3.200000e+01 : f32
    %90 = vector.broadcast %cst_27 : f32 to vector<8x1xf32>
    %91 = arith.divf %89, %90 : vector<8x1xf32>
    %92 = vector.broadcast %84 : vector<8x1xf32> to vector<8x32xf32>
    %93 = arith.subf %80, %92 : vector<8x32xf32>
    %cst_28 = arith.constant 9.99999974E-6 : f32
    %94 = vector.broadcast %cst_28 : f32 to vector<8x1xf32>
    %95 = arith.addf %91, %94 : vector<8x1xf32>
    %96 = math.rsqrt %95 : vector<8x1xf32>
    %97 = vector.broadcast %96 : vector<8x1xf32> to vector<8x32xf32>
    %98 = arith.mulf %93, %97 : vector<8x32xf32>
    %c10 = arith.constant 10 : index
    %c0_29 = arith.constant 0 : index
    %99 = vector.load %arg6[%c10, %c0_29] : memref<16x128xf32, #tpu.memory_space<vmem>>, vector<1x32xf32>
    %100 = vector.broadcast %99 : vector<1x32xf32> to vector<8x32xf32>
    %101 = arith.mulf %98, %100 : vector<8x32xf32>
    %c11 = arith.constant 11 : index
    %c0_30 = arith.constant 0 : index
    %102 = vector.load %arg6[%c11, %c0_30] : memref<16x128xf32, #tpu.memory_space<vmem>>, vector<1x32xf32>
    %103 = vector.broadcast %102 : vector<1x32xf32> to vector<8x32xf32>
    %104 = arith.addf %101, %103 : vector<8x32xf32>
    %105 = arith.truncf %104 : vector<8x32xf32> to vector<8x32xbf16>
    %c128 = arith.constant 128 : index
    %c0_31 = arith.constant 0 : index
    %106 = vector.load %arg5[%c128, %c0_31] : memref<352x128xbf16, #tpu.memory_space<vmem>>, vector<32x32xbf16>
    %cst_32 = arith.constant dense<0.000000e+00> : vector<8x32xf32>
    %107 = tpu.matmul %105, %106, %cst_32 {dimension_numbers = #tpu.dot_dimension_numbers<[1], [0], [0], [1], [0, 0, 1, 1], [], []>} : vector<8x32xbf16>, vector<32x32xbf16>, vector<8x32xf32> -> vector<8x32xf32>
    %c4 = arith.constant 4 : index
    %c0_33 = arith.constant 0 : index
    %108 = vector.load %arg6[%c4, %c0_33] : memref<16x128xf32, #tpu.memory_space<vmem>>, vector<1x32xf32>
    %109 = vector.broadcast %108 : vector<1x32xf32> to vector<8x32xf32>
    %110 = arith.addf %107, %109 : vector<8x32xf32>
    %111 = arith.addf %2, %3 : vector<16x32xf32>
    %112 = arith.truncf %111 : vector<16x32xf32> to vector<16x32xbf16>
    %c160 = arith.constant 160 : index
    %c0_34 = arith.constant 0 : index
    %113 = vector.load %arg5[%c160, %c0_34] : memref<352x128xbf16, #tpu.memory_space<vmem>>, vector<32x32xbf16>
    %cst_35 = arith.constant dense<0.000000e+00> : vector<16x32xf32>
    %114 = tpu.matmul %112, %113, %cst_35 {dimension_numbers = #tpu.dot_dimension_numbers<[1], [0], [0], [1], [0, 0, 1, 1], [], []>} : vector<16x32xbf16>, vector<32x32xbf16>, vector<16x32xf32> -> vector<16x32xf32>
    %c5 = arith.constant 5 : index
    %c0_36 = arith.constant 0 : index
    %115 = vector.load %arg6[%c5, %c0_36] : memref<16x128xf32, #tpu.memory_space<vmem>>, vector<1x32xf32>
    %116 = vector.broadcast %115 : vector<1x32xf32> to vector<16x32xf32>
    %117 = arith.addf %114, %116 : vector<16x32xf32>
    %118 = arith.truncf %2 : vector<16x32xf32> to vector<16x32xbf16>
    %c192 = arith.constant 192 : index
    %c0_37 = arith.constant 0 : index
    %119 = vector.load %arg5[%c192, %c0_37] : memref<352x128xbf16, #tpu.memory_space<vmem>>, vector<32x32xbf16>
    %cst_38 = arith.constant dense<0.000000e+00> : vector<16x32xf32>
    %120 = tpu.matmul %118, %119, %cst_38 {dimension_numbers = #tpu.dot_dimension_numbers<[1], [0], [0], [1], [0, 0, 1, 1], [], []>} : vector<16x32xbf16>, vector<32x32xbf16>, vector<16x32xf32> -> vector<16x32xf32>
    %c6 = arith.constant 6 : index
    %c0_39 = arith.constant 0 : index
    %121 = vector.load %arg6[%c6, %c0_39] : memref<16x128xf32, #tpu.memory_space<vmem>>, vector<1x32xf32>
    %122 = vector.broadcast %121 : vector<1x32xf32> to vector<16x32xf32>
    %123 = arith.addf %120, %122 : vector<16x32xf32>
    %124 = vector.extract_strided_slice %110 {offsets = [0, 0], sizes = [8, 8], strides = [1, 1]} : vector<8x32xf32> to vector<8x8xf32>
    %125 = vector.extract_strided_slice %110 {offsets = [0, 8], sizes = [8, 8], strides = [1, 1]} : vector<8x32xf32> to vector<8x8xf32>
    %126 = vector.extract_strided_slice %110 {offsets = [0, 16], sizes = [8, 8], strides = [1, 1]} : vector<8x32xf32> to vector<8x8xf32>
    %127 = vector.extract_strided_slice %110 {offsets = [0, 24], sizes = [8, 8], strides = [1, 1]} : vector<8x32xf32> to vector<8x8xf32>
    %128 = vector.shape_cast %124 : vector<8x8xf32> to vector<1x8x8xf32>
    %129 = vector.shape_cast %125 : vector<8x8xf32> to vector<1x8x8xf32>
    %130 = vector.shape_cast %126 : vector<8x8xf32> to vector<1x8x8xf32>
    %131 = vector.shape_cast %127 : vector<8x8xf32> to vector<1x8x8xf32>
    %132 = tpu.concatenate %128, %129, %130, %131 in 0 : vector<1x8x8xf32>, vector<1x8x8xf32>, vector<1x8x8xf32>, vector<1x8x8xf32> -> vector<4x8x8xf32>
    %133 = vector.extract_strided_slice %117 {offsets = [0, 0], sizes = [16, 8], strides = [1, 1]} : vector<16x32xf32> to vector<16x8xf32>
    %134 = vector.extract_strided_slice %117 {offsets = [0, 8], sizes = [16, 8], strides = [1, 1]} : vector<16x32xf32> to vector<16x8xf32>
    %135 = vector.extract_strided_slice %117 {offsets = [0, 16], sizes = [16, 8], strides = [1, 1]} : vector<16x32xf32> to vector<16x8xf32>
    %136 = vector.extract_strided_slice %117 {offsets = [0, 24], sizes = [16, 8], strides = [1, 1]} : vector<16x32xf32> to vector<16x8xf32>
    %137 = vector.shape_cast %133 : vector<16x8xf32> to vector<1x16x8xf32>
    %138 = vector.shape_cast %134 : vector<16x8xf32> to vector<1x16x8xf32>
    %139 = vector.shape_cast %135 : vector<16x8xf32> to vector<1x16x8xf32>
    %140 = vector.shape_cast %136 : vector<16x8xf32> to vector<1x16x8xf32>
    %141 = tpu.concatenate %137, %138, %139, %140 in 0 : vector<1x16x8xf32>, vector<1x16x8xf32>, vector<1x16x8xf32>, vector<1x16x8xf32> -> vector<4x16x8xf32>
    %142 = vector.extract_strided_slice %123 {offsets = [0, 0], sizes = [16, 8], strides = [1, 1]} : vector<16x32xf32> to vector<16x8xf32>
    %143 = vector.extract_strided_slice %123 {offsets = [0, 8], sizes = [16, 8], strides = [1, 1]} : vector<16x32xf32> to vector<16x8xf32>
    %144 = vector.extract_strided_slice %123 {offsets = [0, 16], sizes = [16, 8], strides = [1, 1]} : vector<16x32xf32> to vector<16x8xf32>
    %145 = vector.extract_strided_slice %123 {offsets = [0, 24], sizes = [16, 8], strides = [1, 1]} : vector<16x32xf32> to vector<16x8xf32>
    %146 = vector.shape_cast %142 : vector<16x8xf32> to vector<1x16x8xf32>
    %147 = vector.shape_cast %143 : vector<16x8xf32> to vector<1x16x8xf32>
    %148 = vector.shape_cast %144 : vector<16x8xf32> to vector<1x16x8xf32>
    %149 = vector.shape_cast %145 : vector<16x8xf32> to vector<1x16x8xf32>
    %150 = tpu.concatenate %146, %147, %148, %149 in 0 : vector<1x16x8xf32>, vector<1x16x8xf32>, vector<1x16x8xf32>, vector<1x16x8xf32> -> vector<4x16x8xf32>
    %151 = arith.truncf %132 : vector<4x8x8xf32> to vector<4x8x8xbf16>
    %152 = arith.truncf %141 : vector<4x16x8xf32> to vector<4x16x8xbf16>
    "tpu.trace_start"() <{level = 10 : i32, message = "hqd,hkd->hqk"}> : () -> ()
    %cst_40 = arith.constant dense<0.000000e+00> : vector<4x8x16xf32>
    %153 = tpu.matmul %151, %152, %cst_40 {dimension_numbers = #tpu.dot_dimension_numbers<[2], [2], [1], [1], [0, 0, 0, 1, 1, 1], [0], [0]>} : vector<4x8x8xbf16>, vector<4x16x8xbf16>, vector<4x8x16xf32> -> vector<4x8x16xf32>
    "tpu.trace_stop"() : () -> ()
    %cst_41 = arith.constant dense<0xFF800000> : vector<4x8xf32>
    %154 = vector.multi_reduction <maximumf>, %153, %cst_41 [2] : vector<4x8x16xf32> to vector<4x8xf32>
    %155 = vector.shape_cast %154 : vector<4x8xf32> to vector<4x8x1xf32>
    %156 = vector.broadcast %155 : vector<4x8x1xf32> to vector<4x8x16xf32>
    %157 = arith.subf %153, %156 : vector<4x8x16xf32>
    %158 = math.exp %157 : vector<4x8x16xf32>
    %cst_42 = arith.constant dense<0.000000e+00> : vector<4x8xf32>
    %159 = vector.multi_reduction <add>, %158, %cst_42 [2] : vector<4x8x16xf32> to vector<4x8xf32>
    %160 = vector.shape_cast %159 : vector<4x8xf32> to vector<4x8x1xf32>
    %161 = tpu.reciprocal %160 {approx = true} : vector<4x8x1xf32> -> vector<4x8x1xf32>
    %162 = vector.broadcast %161 : vector<4x8x1xf32> to vector<4x8x16xf32>
    %163 = arith.mulf %158, %162 : vector<4x8x16xf32>
    %164 = arith.truncf %163 : vector<4x8x16xf32> to vector<4x8x16xbf16>
    %165 = arith.truncf %150 : vector<4x16x8xf32> to vector<4x16x8xbf16>
    "tpu.trace_start"() <{level = 10 : i32, message = "hqk,hkd->hqd"}> : () -> ()
    %cst_43 = arith.constant dense<0.000000e+00> : vector<4x8x8xf32>
    %166 = tpu.matmul %164, %165, %cst_43 {dimension_numbers = #tpu.dot_dimension_numbers<[2], [1], [1], [2], [0, 0, 0, 1, 1, 2], [0], [0]>} : vector<4x8x16xbf16>, vector<4x16x8xbf16>, vector<4x8x8xf32> -> vector<4x8x8xf32>
    "tpu.trace_stop"() : () -> ()
    %167 = vector.extract_strided_slice %166 {offsets = [0, 0, 0], sizes = [1, 8, 8], strides = [1, 1, 1]} : vector<4x8x8xf32> to vector<1x8x8xf32>
    %168 = vector.shape_cast %167 : vector<1x8x8xf32> to vector<8x8xf32>
    %169 = vector.extract_strided_slice %166 {offsets = [1, 0, 0], sizes = [1, 8, 8], strides = [1, 1, 1]} : vector<4x8x8xf32> to vector<1x8x8xf32>
    %170 = vector.shape_cast %169 : vector<1x8x8xf32> to vector<8x8xf32>
    %171 = vector.extract_strided_slice %166 {offsets = [2, 0, 0], sizes = [1, 8, 8], strides = [1, 1, 1]} : vector<4x8x8xf32> to vector<1x8x8xf32>
    %172 = vector.shape_cast %171 : vector<1x8x8xf32> to vector<8x8xf32>
    %173 = vector.extract_strided_slice %166 {offsets = [3, 0, 0], sizes = [1, 8, 8], strides = [1, 1, 1]} : vector<4x8x8xf32> to vector<1x8x8xf32>
    %174 = vector.shape_cast %173 : vector<1x8x8xf32> to vector<8x8xf32>
    %175 = tpu.concatenate %168, %170, %172, %174 in 1 : vector<8x8xf32>, vector<8x8xf32>, vector<8x8xf32>, vector<8x8xf32> -> vector<8x32xf32>
    %176 = arith.truncf %175 : vector<8x32xf32> to vector<8x32xbf16>
    %c224 = arith.constant 224 : index
    %c0_44 = arith.constant 0 : index
    %177 = vector.load %arg5[%c224, %c0_44] : memref<352x128xbf16, #tpu.memory_space<vmem>>, vector<32x32xbf16>
    %cst_45 = arith.constant dense<0.000000e+00> : vector<8x32xf32>
    %178 = tpu.matmul %176, %177, %cst_45 {dimension_numbers = #tpu.dot_dimension_numbers<[1], [0], [0], [1], [0, 0, 1, 1], [], []>} : vector<8x32xbf16>, vector<32x32xbf16>, vector<8x32xf32> -> vector<8x32xf32>
    %c7 = arith.constant 7 : index
    %c0_46 = arith.constant 0 : index
    %179 = vector.load %arg6[%c7, %c0_46] : memref<16x128xf32, #tpu.memory_space<vmem>>, vector<1x32xf32>
    %180 = vector.broadcast %179 : vector<1x32xf32> to vector<8x32xf32>
    %181 = arith.addf %178, %180 : vector<8x32xf32>
    %182 = arith.addf %104, %181 : vector<8x32xf32>
    %cst_47 = arith.constant dense<0.000000e+00> : vector<8xf32>
    %183 = vector.multi_reduction <add>, %182, %cst_47 [1] : vector<8x32xf32> to vector<8xf32>
    %184 = vector.shape_cast %183 : vector<8xf32> to vector<8x1xf32>
    %cst_48 = arith.constant 3.200000e+01 : f32
    %185 = vector.broadcast %cst_48 : f32 to vector<8x1xf32>
    %186 = arith.divf %184, %185 : vector<8x1xf32>
    %187 = vector.broadcast %186 : vector<8x1xf32> to vector<8x32xf32>
    %188 = arith.subf %182, %187 : vector<8x32xf32>
    %189 = arith.mulf %188, %188 : vector<8x32xf32>
    %cst_49 = arith.constant dense<0.000000e+00> : vector<8xf32>
    %190 = vector.multi_reduction <add>, %189, %cst_49 [1] : vector<8x32xf32> to vector<8xf32>
    %191 = vector.shape_cast %190 : vector<8xf32> to vector<8x1xf32>
    %cst_50 = arith.constant 3.200000e+01 : f32
    %192 = vector.broadcast %cst_50 : f32 to vector<8x1xf32>
    %193 = arith.divf %191, %192 : vector<8x1xf32>
    %194 = vector.broadcast %186 : vector<8x1xf32> to vector<8x32xf32>
    %195 = arith.subf %182, %194 : vector<8x32xf32>
    %cst_51 = arith.constant 9.99999974E-6 : f32
    %196 = vector.broadcast %cst_51 : f32 to vector<8x1xf32>
    %197 = arith.addf %193, %196 : vector<8x1xf32>
    %198 = math.rsqrt %197 : vector<8x1xf32>
    %199 = vector.broadcast %198 : vector<8x1xf32> to vector<8x32xf32>
    %200 = arith.mulf %195, %199 : vector<8x32xf32>
    %c12 = arith.constant 12 : index
    %c0_52 = arith.constant 0 : index
    %201 = vector.load %arg6[%c12, %c0_52] : memref<16x128xf32, #tpu.memory_space<vmem>>, vector<1x32xf32>
    %202 = vector.broadcast %201 : vector<1x32xf32> to vector<8x32xf32>
    %203 = arith.mulf %200, %202 : vector<8x32xf32>
    %c13 = arith.constant 13 : index
    %c0_53 = arith.constant 0 : index
    %204 = vector.load %arg6[%c13, %c0_53] : memref<16x128xf32, #tpu.memory_space<vmem>>, vector<1x32xf32>
    %205 = vector.broadcast %204 : vector<1x32xf32> to vector<8x32xf32>
    %206 = arith.addf %203, %205 : vector<8x32xf32>
    %207 = arith.truncf %206 : vector<8x32xf32> to vector<8x32xbf16>
    %c256 = arith.constant 256 : index
    %c0_54 = arith.constant 0 : index
    %208 = vector.load %arg5[%c256, %c0_54] : memref<352x128xbf16, #tpu.memory_space<vmem>>, vector<32x64xbf16>
    %cst_55 = arith.constant dense<0.000000e+00> : vector<8x64xf32>
    %209 = tpu.matmul %207, %208, %cst_55 {dimension_numbers = #tpu.dot_dimension_numbers<[1], [0], [0], [1], [0, 0, 1, 1], [], []>} : vector<8x32xbf16>, vector<32x64xbf16>, vector<8x64xf32> -> vector<8x64xf32>
    %c8 = arith.constant 8 : index
    %c0_56 = arith.constant 0 : index
    %210 = vector.load %arg6[%c8, %c0_56] : memref<16x128xf32, #tpu.memory_space<vmem>>, vector<1x64xf32>
    %211 = vector.broadcast %210 : vector<1x64xf32> to vector<8x64xf32>
    %212 = arith.addf %209, %211 : vector<8x64xf32>
    %cst_57 = arith.constant 0.000000e+00 : f32
    %213 = vector.broadcast %cst_57 : f32 to vector<8x64xf32>
    %214 = arith.maximumf %212, %213 : vector<8x64xf32>
    %215 = arith.truncf %214 : vector<8x64xf32> to vector<8x64xbf16>
    %c288 = arith.constant 288 : index
    %c0_58 = arith.constant 0 : index
    %216 = vector.load %arg5[%c288, %c0_58] : memref<352x128xbf16, #tpu.memory_space<vmem>>, vector<64x32xbf16>
    %cst_59 = arith.constant dense<0.000000e+00> : vector<8x32xf32>
    %217 = tpu.matmul %215, %216, %cst_59 {dimension_numbers = #tpu.dot_dimension_numbers<[1], [0], [0], [1], [0, 0, 1, 1], [], []>} : vector<8x64xbf16>, vector<64x32xbf16>, vector<8x32xf32> -> vector<8x32xf32>
    %c9 = arith.constant 9 : index
    %c0_60 = arith.constant 0 : index
    %218 = vector.load %arg6[%c9, %c0_60] : memref<16x128xf32, #tpu.memory_space<vmem>>, vector<1x32xf32>
    %219 = vector.broadcast %218 : vector<1x32xf32> to vector<8x32xf32>
    %220 = arith.addf %217, %219 : vector<8x32xf32>
    %221 = arith.addf %206, %220 : vector<8x32xf32>
    %cst_61 = arith.constant dense<0.000000e+00> : vector<8xf32>
    %222 = vector.multi_reduction <add>, %221, %cst_61 [1] : vector<8x32xf32> to vector<8xf32>
    %223 = vector.shape_cast %222 : vector<8xf32> to vector<8x1xf32>
    %cst_62 = arith.constant 3.200000e+01 : f32
    %224 = vector.broadcast %cst_62 : f32 to vector<8x1xf32>
    %225 = arith.divf %223, %224 : vector<8x1xf32>
    %226 = vector.broadcast %225 : vector<8x1xf32> to vector<8x32xf32>
    %227 = arith.subf %221, %226 : vector<8x32xf32>
    %228 = arith.mulf %227, %227 : vector<8x32xf32>
    %cst_63 = arith.constant dense<0.000000e+00> : vector<8xf32>
    %229 = vector.multi_reduction <add>, %228, %cst_63 [1] : vector<8x32xf32> to vector<8xf32>
    %230 = vector.shape_cast %229 : vector<8xf32> to vector<8x1xf32>
    %cst_64 = arith.constant 3.200000e+01 : f32
    %231 = vector.broadcast %cst_64 : f32 to vector<8x1xf32>
    %232 = arith.divf %230, %231 : vector<8x1xf32>
    %233 = vector.broadcast %225 : vector<8x1xf32> to vector<8x32xf32>
    %234 = arith.subf %221, %233 : vector<8x32xf32>
    %cst_65 = arith.constant 9.99999974E-6 : f32
    %235 = vector.broadcast %cst_65 : f32 to vector<8x1xf32>
    %236 = arith.addf %232, %235 : vector<8x1xf32>
    %237 = math.rsqrt %236 : vector<8x1xf32>
    %238 = vector.broadcast %237 : vector<8x1xf32> to vector<8x32xf32>
    %239 = arith.mulf %234, %238 : vector<8x32xf32>
    %c14 = arith.constant 14 : index
    %c0_66 = arith.constant 0 : index
    %240 = vector.load %arg6[%c14, %c0_66] : memref<16x128xf32, #tpu.memory_space<vmem>>, vector<1x32xf32>
    %241 = vector.broadcast %240 : vector<1x32xf32> to vector<8x32xf32>
    %242 = arith.mulf %239, %241 : vector<8x32xf32>
    %c15 = arith.constant 15 : index
    %c0_67 = arith.constant 0 : index
    %243 = vector.load %arg6[%c15, %c0_67] : memref<16x128xf32, #tpu.memory_space<vmem>>, vector<1x32xf32>
    %244 = vector.broadcast %243 : vector<1x32xf32> to vector<8x32xf32>
    %245 = arith.addf %242, %244 : vector<8x32xf32>
    %c0_68 = arith.constant 0 : index
    %c0_69 = arith.constant 0 : index
    %246 = vector.load %arg7[%c0_68, %c0_69] : memref<8x32xf32, #tpu.memory_space<vmem>>, vector<8x32xf32>
    tpu.vector_store %arg7[%c0_68, %c0_69], %245 {strides = array<i32>} : memref<8x32xf32, #tpu.memory_space<vmem>>, vector<8x32xf32>,
    return
  }
  func.func @transform_0(%arg0: i32) -> (i32, i32) {
    %c0_i32 = arith.constant 0 : i32
    %c0_i32_0 = arith.constant 0 : i32
    return %arg0, %c0_i32 : i32, i32
  }
  func.func @transform_1(%arg0: i32) -> (i32, i32) {
    %c0_i32 = arith.constant 0 : i32
    %c0_i32_0 = arith.constant 0 : i32
    return %arg0, %c0_i32 : i32, i32
  }
  func.func @transform_2(%arg0: i32) -> (i32, i32) {
    %c0_i32 = arith.constant 0 : i32
    %c0_i32_0 = arith.constant 0 : i32
    return %arg0, %c0_i32 : i32, i32
  }
  func.func @transform_3(%arg0: i32) -> (i32, i32) {
    %c0_i32 = arith.constant 0 : i32
    %c0_i32_0 = arith.constant 0 : i32
    return %arg0, %c0_i32 : i32, i32
  }
  func.func @transform_4(%arg0: i32) -> (i32, i32) {
    %c0_i32 = arith.constant 0 : i32
    %c0_i32_0 = arith.constant 0 : i32
    %c0_i32_1 = arith.constant 0 : i32
    return %c0_i32, %c0_i32_0 : i32, i32
  }
  func.func @transform_5(%arg0: i32) -> (i32, i32) {
    %c0_i32 = arith.constant 0 : i32
    %c0_i32_0 = arith.constant 0 : i32
    %c0_i32_1 = arith.constant 0 : i32
    return %c0_i32, %c0_i32_0 : i32, i32
  }
  func.func @transform_6(%arg0: i32) -> (i32, i32) {
    %c0_i32 = arith.constant 0 : i32
    %c0_i32_0 = arith.constant 0 : i32
    return %arg0, %c0_i32 : i32, i32
  }
}

</mosaic_0001>

<bundles_post_ra>
// kernel: apply.1
= control target key start
LH: loop header
LB: loop body
LE: loop exit
PB: predicated region body
PF: predicated region fallthrough
CT: control target
= control target key end

     0   :  { %s3590_s0 = inlined_call_operand.hbm [shape: f32[16,32], index: 0, kind: input, shape index: {}]   ;;  %s3591_s1 = inlined_call_operand.hbm [shape: f32[16,32], index: 1, kind: input, shape index: {}]   ;;  %s3592_s2 = inlined_call_operand.hbm [shape: f32[32,32], index: 2, kind: input, shape index: {}]   ;;  %s3593_s3 = inlined_call_operand.hbm [shape: f32[32,32], index: 3, kind: input, shape index: {}]   ;;  %s3594_s4 = inlined_call_operand.hbm [shape: bf16[352,128], index: 4, kind: input, shape index: {}]   ;;  %s3595_s5 = inlined_call_operand.vmem [shape: f32[16,128], index: 5, kind: input, shape index: {}]   ;;  %s3596_s6 = inlined_call_operand.hbm [shape: f32[16,32], index: 6, kind: output, shape index: {}]  }
   0x1   :  { %3609 = sst [smem:[#allocation21_spill]] %s3591_s1 }
   0x2   :  { %3610 = sst [smem:[#allocation22_spill]] %s3594_s4 }
   0x3   :  { %11 = vsyncpa [#allocation3], 0 }
   0x4   :  { %13 = vsyncpa [#allocation3 + $0x1], 0 }
   0x5   :  { %14 = vsyncpa [#allocation6], 0 }
   0x6   :  { %16 = vsyncpa [#allocation6 + $0x1], 0 }
   0x7   :  { %17 = vsyncpa [#allocation9], 0 }
   0x8   :  { %19 = vsyncpa [#allocation9 + $0x1], 0 }
   0x9   :  { %20 = vsyncpa [#allocation4], 0 }
   0xa   :  { %22 = vsyncpa [#allocation4 + $0x1], 0  ;;  %s3048_s21 = smov 0   ;;  %s3050_s22 = smov 0  }
   0xb   :  { %s3052_s23 = smov 0   ;;  %s3054_s24 = smov 0  }
   0xc LB: > { %3611 = sst [smem:[#allocation17_spill]] %s2989_s23  ;;  %s3069_s25 = sadd.s32 4294967295, %s2993_s24   ;;  %s2993_s24 = sphi %s3054_s24, %s3639_s24   ;;  %s2989_s23 = sphi %s3052_s23, %s3641_s23   ;;  %s2985_s22 = sphi %s3050_s22, %s3643_s22   ;;  %s2981_s21 = sphi %s3048_s21, %s3642_s21  }
   0xd   : > { %s2270_s26 = sadd.s32 4294967294, %s2993_s24   ;;  %p48_p0 = scmp.ne.s32.totalorder %s2985_s22, %s2981_s21 }
   0xe   : > { %p3600_p1 = scmp.eq.s32.totalorder %s3069_s25, 0  ;;  %p198_p3 = scmp.eq.s32.totalorder %s2270_s26, 1 }
   0xf   : > { %p2271_p5 = scmp.ge.s32.totalorder %s2993_s24, 1  ;;  %p205_p7 = scmp.lt.s32.totalorder %s2993_s24, 3 }
  0x10   : > { %p3078_p4 = por %p3600_p1, %p48_p0  ;;  %p3083_p6 = por %p198_p3, %p48_p0 }
  0x11   : > { %p3088_p8 = pnand %p2271_p5, %p205_p7  ;;  %s2995_s30 = smov [#allocation10]  }
  0x12   : > { %s3612_s27 = scalar_select %p3078_p4, 1, 0 }
  0x13   : > { %s3613_s28 = scalar_select %p3083_p6, 1, 0 }
  0x14   : > { %s3615_s29 = scalar_select %p3088_p8, 1, 0 }
  0x15   : > { %3614 = sst [smem:[#allocation18_spill]] %s3613_s28  ;;  %s217_s7 = sshll.u32 %s2995_s30, 4  ;;  %s218_s7 = int_to_ptr.vmem [resolvable:$true] %s217_s7 }
  0x16   : > { %p2619_p9 = pneg %p3088_p8  ;;  %s3102_s9 = sadd.s32 1, %s2993_s24  }
  0x17   : > { %3617 = sst [smem:[#allocation19_spill]] %s3102_s9  ;;  %s35_s10 = sadd.s32 1, %s2989_s23 }
  0x18   : > { %p3097_p11 = pnand %p2619_p9, %p3600_p1  ;;  %s32_s11 = ssub.s32 %s2993_s24, %s3102_s9 }
  0x19   : > { %s2790_s12 = scalar_lea.vmem %s218_s7, 2816  ;;  %p2798_p5 = scmp.lt.s32.totalorder %s218_s7, %s218_s7 }
  0x1a   : > { %p2781_p12 = pneg %p3097_p11  ;;  %p2791_p13 = scmp.ne.s32.totalorder %s218_s7, %s2790_s12 }
  0x1b   : > { %p2799_p7 = scmp.lt.s32.totalorder %s2790_s12, %s2790_s12 }
  0x1c   : > { %p2793_p0 = pnand %p2791_p13, %p2781_p12 }
  0x1d   : > { %p2800_p10 = por %p2799_p7, %p2798_p5 }
  0x1e   : > { %p2794_p3 = pneg %p2793_p0 }
  0x20   : > { %p2801_p2 = pnand %p2800_p10, %p2794_p3 }
  0x22   : > { %2804 = shalt.err (!%p2801_p2)
}
  0x23   : > { %s2996_s13 = smov 64   ;;  %s2997_s14 = smov 4  }
  0x24   : > { %s3618_s4 = sld [smem:[#allocation22_spill]]  ;;  %p33_p9 = scmp.eq.s32.totalorder %s32_s11, 0 }
  0x25   : > { %p42_p2 = scmp.ne.s32.totalorder %s2989_s23, %s2985_s22  ;;  %p43_p10 = scmp.eq.s32.totalorder %s2993_s24, 0 }
  0x26   : > { %p2641_p12 = scmp.lt.s32.totalorder %s2993_s24, 2  ;;  %p3620_p0 = scmp.eq.s32.totalorder %s3069_s25, 1 }
  0x27   : > { %s3119_s17 = scalar_select %p33_p9, %s2989_s23, %s35_s10  }
  0x28   : > { %p44_p13 = por %p43_p10, %p42_p2  ;;  %p3123_p3 = por %p3620_p0, %p42_p2 }
  0x29   : > { %3619 = sst [smem:[#allocation20_spill]] %s3119_s17  ;;  %s3128_s19 = sand.u32 1, %s2989_s23  }
  0x2a   : > { %2622 = dma.hbm_to_vmem [thread:$0]  (!%p3097_p11), %s3618_s4, 2816, %s218_s7, [#allocation9], %s2996_s13, %s2996_s13, %s2997_s14  }
  0x2b   : > { %s3621_s18 = scalar_select %p3123_p3, 1, 0 }
  0x2c   : > { %s3598_s20 = sshll.u32 %s2993_s24, 7  ;;  %s3597_s26 = sshll.u32 %s3128_s19, 3 }
  0x2d   : > { %p3132_p11 = pnand %p2641_p12, %p44_p13  ;;  %s3599_s7 = sand.u32 1, %s2993_s24  }
  0x2e   : > { %s3623_s1 = sld [smem:[#allocation21_spill]]  ;;  %s256_s12 = scalar_lea.vmem [#allocation5], %s3597_s26 }
  0x2f   : > { %s263_s13 = sshll.u32 %s256_s12, 4  ;;  %s3149_s15 = scalar_lea.sflag [#allocation6], %s3599_s7  ;;  %s264_s13 = int_to_ptr.vmem [resolvable:$true] %s263_s13 }
  0x30   : > { %p3155_p7 = pneg %p3132_p11 }
  0x34   : > { %s3142_s11 = scalar_lea.hbm %s3623_s1, %s3598_s20  ;;  %s2810_s12 = scalar_lea.hbm %s3623_s1, 256 }
  0x35   : > { %s2805_s16 = scalar_lea.hbm %s3142_s11, 128  ;;  %p2811_p10 = scmp.lt.s32.totalorder %s3142_s11, %s3623_s1 }
  0x36   : > { %p2806_p5 = scmp.ne.s32.totalorder %s3142_s11, %s2805_s16  ;;  %p2812_p12 = scmp.lt.s32.totalorder %s2810_s12, %s2805_s16 }
  0x38   : > { %p2808_p9 = pnand %p3155_p7, %p2806_p5  ;;  %p2813_p13 = por %p2812_p12, %p2811_p10 }
  0x3a   : > { %p2809_p2 = pneg %p2808_p9 }
  0x3c   : > { %p2814_p0 = pnand %p2813_p13, %p2809_p2 }
  0x3e   : > { %2817 = shalt.err (!%p2814_p0)
}
  0x3f   : > { %s2818_s7 = scalar_lea.vmem %s264_s13, 128  ;;  %s2998_s14 = smov [#allocation5]  }
  0x40   : > { %p2819_p1 = scmp.ne.s32.totalorder %s264_s13, %s2818_s7  ;;  %s2823_s17 = sshll.u32 %s2998_s14, 4  ;;  %s2824_s17 = int_to_ptr.vmem [resolvable:$false] %s2823_s17 }
  0x41   : > { %s2825_s23 = scalar_lea.vmem %s2824_s17, 256  ;;  %p2826_p5 = scmp.lt.s32.totalorder %s264_s13, %s2824_s17 }
  0x42   : > { %p2821_p6 = pnand %p2819_p1, %p3155_p7  ;;  %p2827_p9 = scmp.lt.s32.totalorder %s2825_s23, %s2818_s7 }
  0x44   : > { %p2822_p3 = pneg %p2821_p6  ;;  %p2828_p4 = por %p2827_p9, %p2826_p5 }
  0x46   : > { %p2829_p8 = pnand %p2828_p4, %p2822_p3 }
  0x48   : > { %2832 = shalt.err (!%p2829_p8)
}
  0x49   : > { %2629 = dma.hbm_to_vmem [thread:$0]  (!%p3132_p11), %s3142_s11, 128, %s264_s13, %s3149_s15  }
  0x4a   : > { %s3625_s20 = sshll.u32 %s3128_s19, 4  ;;  %s3627_s16 = sshll.u32 %s2993_s24, 7 }
  0x4b   : > { %s274_s26 = scalar_lea.vmem [#allocation7], %s3625_s20  ;;  %s3626_s23 = smov %s3625_s20 }
  0x4c   : > { %s281_s17 = sshll.u32 %s274_s26, 4  ;;  %s295_s7 = scalar_lea.vmem [#allocation8], %s3626_s23  ;;  %s3176_s17 = int_to_ptr.vmem [resolvable:$true] %s281_s17 }
  0x4d   : > { %s302_s14 = sshll.u32 %s295_s7, 4  ;;  %s3187_s12 = scalar_lea.hbm %s3590_s0, %s3627_s16  ;;  %s3180_s14 = int_to_ptr.vmem [resolvable:$true] %s302_s14 }
  0x4e   : > { %s3628_s1 = sshll.u32 %s3128_s19, 3  ;;  %s3608_s20 = sshll.u32 %s2993_s24, 8 }
  0x4f   : > { %s238_s11 = scalar_lea.vmem [#allocation2], %s3628_s1  ;;  %s3197_s7 = scalar_lea.hbm %s3592_s2, %s3608_s20 }
  0x50   : > { %s245_s13 = sshll.u32 %s238_s11, 4  ;;  %s235_s9 = scalar_lea.sflag [#allocation3], %s3128_s19  ;;  %s246_s13 = int_to_ptr.vmem [resolvable:$true] %s245_s13 }
  0x51   : > { %s2833_s28 = scalar_lea.hbm %s3187_s12, 128  ;;  %s2838_s10 = scalar_lea.hbm %s3590_s0, 256 }
  0x52   : > { %p2834_p1 = scmp.ne.s32.totalorder %s3187_s12, %s2833_s28  ;;  %p2839_p8 = scmp.lt.s32.totalorder %s3187_s12, %s3590_s0 }
  0x53   : > { %p2840_p3 = scmp.lt.s32.totalorder %s2838_s10, %s2833_s28 }
  0x54   : > { %p2836_p4 = pnand %p2834_p1, %p3155_p7 }
  0x55   : > { %p2841_p2 = por %p2840_p3, %p2839_p8 }
  0x56   : > { %p2837_p6 = pneg %p2836_p4 }
  0x58   : > { %p2842_p10 = pnand %p2841_p2, %p2837_p6 }
  0x5a   : > { %2845 = shalt.err (!%p2842_p10)
}
  0x5b   : > { %s2846_s26 = scalar_lea.vmem %s246_s13, 128  ;;  %s2999_s19 = smov [#allocation2]  }
  0x5c   : > { %p2847_p12 = scmp.ne.s32.totalorder %s246_s13, %s2846_s26  ;;  %s2851_s23 = sshll.u32 %s2999_s19, 4  ;;  %s2852_s23 = int_to_ptr.vmem [resolvable:$false] %s2851_s23 }
  0x5d   : > { %s2853_s20 = scalar_lea.vmem %s2852_s23, 256  ;;  %p2854_p5 = scmp.lt.s32.totalorder %s246_s13, %s2852_s23 }
  0x5e   : > { %p2849_p13 = pnand %p2847_p12, %p3155_p7  ;;  %p2855_p9 = scmp.lt.s32.totalorder %s2853_s20, %s2846_s26 }
  0x60   : > { %p2850_p0 = pneg %p2849_p13  ;;  %p2856_p1 = por %p2855_p9, %p2854_p5 }
  0x62   : > { %p2857_p4 = pnand %p2856_p1, %p2850_p0 }
  0x64   : > { %2860 = shalt.err (!%p2857_p4)
}
  0x65   : > { %2626 = dma.hbm_to_vmem [thread:$0]  (!%p3132_p11), %s3187_s12, 128, %s246_s13, %s235_s9  }
  0x66   : > { %s2861_s28 = scalar_lea.hbm %s3197_s7, 256  ;;  %s2866_s20 = scalar_lea.hbm %s3592_s2, 512 }
  0x67   : > { %p2862_p6 = scmp.ne.s32.totalorder %s3197_s7, %s2861_s28  ;;  %p2867_p2 = scmp.lt.s32.totalorder %s3197_s7, %s3592_s2 }
  0x68   : > { %p2868_p10 = scmp.lt.s32.totalorder %s2866_s20, %s2861_s28 }
  0x69   : > { %p2864_p8 = pnand %p2862_p6, %p3155_p7 }
  0x6a   : > { %p2869_p12 = por %p2868_p10, %p2867_p2 }
  0x6b   : > { %p2865_p3 = pneg %p2864_p8 }
  0x6d   : > { %p2870_p13 = pnand %p2869_p12, %p2865_p3 }
  0x6f   : > { %2873 = shalt.err (!%p2870_p13)
}
  0x70   : > { %s2874_s9 = scalar_lea.vmem %s3176_s17, 256  ;;  %s3000_s12 = smov [#allocation7]  }
  0x71   : > { %p2875_p0 = scmp.ne.s32.totalorder %s3176_s17, %s2874_s9  ;;  %s2879_s13 = sshll.u32 %s3000_s12, 4  ;;  %s2880_s13 = int_to_ptr.vmem [resolvable:$false] %s2879_s13 }
  0x72   : > { %s2881_s11 = scalar_lea.vmem %s2880_s13, 512  ;;  %p2882_p1 = scmp.lt.s32.totalorder %s3176_s17, %s2880_s13 }
  0x73   : > { %p2877_p5 = pnand %p2875_p0, %p3155_p7  ;;  %p2883_p4 = scmp.lt.s32.totalorder %s2881_s11, %s2874_s9 }
  0x75   : > { %p2878_p9 = pneg %p2877_p5  ;;  %p2884_p6 = por %p2883_p4, %p2882_p1 }
  0x77   : > { %p2885_p8 = pnand %p2884_p6, %p2878_p9 }
  0x79   : > { %2888 = shalt.err (!%p2885_p8)
}
  0x7a   : > { %s3001_s26 = smov 128   ;;  %s3002_s19 = smov 8  }
  0x7b   : > { %2632 = dma.hbm_to_vmem [thread:$0]  (!%p3132_p11), %s3197_s7, 256, %s3176_s17, %s3149_s15, %s3001_s26, %s3001_s26, %s3002_s19  }
  0x7c   : > { %s3629_s23 = sshll.u32 %s2993_s24, 8  ;;  %s3630_s20 = sand.u32 1, %s2993_s24  }
  0x7d   : > { %s3245_s8 = scalar_lea.hbm %s3593_s3, %s3629_s23  ;;  %s292_s10 = scalar_lea.sflag [#allocation9], %s3630_s20 }
  0x7e   : > { %s2889_s1 = scalar_lea.hbm %s3245_s8, 256  ;;  %s2894_s15 = scalar_lea.hbm %s3593_s3, 512 }
  0x7f   : > { %p2890_p3 = scmp.ne.s32.totalorder %s3245_s8, %s2889_s1  ;;  %p2895_p12 = scmp.lt.s32.totalorder %s3245_s8, %s3593_s3 }
  0x80   : > { %p2896_p13 = scmp.lt.s32.totalorder %s2894_s15, %s2889_s1 }
  0x81   : > { %p2892_p2 = pnand %p2890_p3, %p3155_p7 }
  0x82   : > { %p2897_p0 = por %p2896_p13, %p2895_p12 }
  0x83   : > { %p2893_p10 = pneg %p2892_p2 }
  0x85   : > { %p2898_p5 = pnand %p2897_p0, %p2893_p10 }
  0x87   : > { %2901 = shalt.err (!%p2898_p5)
}
  0x88   : > { %s2902_s13 = scalar_lea.vmem %s3180_s14, 256  ;;  %s3003_s11 = smov [#allocation8]  }
  0x89   : > { %p2903_p9 = scmp.ne.s32.totalorder %s3180_s14, %s2902_s13  ;;  %s2907_s23 = sshll.u32 %s3003_s11, 4  ;;  %s2908_s23 = int_to_ptr.vmem [resolvable:$false] %s2907_s23 }
  0x8a   : > { %s2909_s28 = scalar_lea.vmem %s2908_s23, 512  ;;  %p2910_p6 = scmp.lt.s32.totalorder %s3180_s14, %s2908_s23 }
  0x8b   : > { %p2905_p1 = pnand %p2903_p9, %p3155_p7  ;;  %p2911_p8 = scmp.lt.s32.totalorder %s2909_s28, %s2902_s13 }
  0x8d   : > { %p2906_p4 = pneg %p2905_p1  ;;  %p2912_p3 = por %p2911_p8, %p2910_p6 }
  0x8f   : > { %p2913_p2 = pnand %p2912_p3, %p2906_p4 }
  0x91   : > { %2916 = shalt.err (!%p2913_p2)
}
  0x92   : > { %2635 = dma.hbm_to_vmem [thread:$0]  (!%p3132_p11), %s3245_s8, 256, %s3180_s14, %s292_s10, %s3001_s26, %s3001_s26, %s3002_s19  }
  0x93   : > { %p3631_p7 = scmp.ne.s32.totalorder %s3615_s29, 0 }
  0x94   : > { %s3275_s4 = sand.u32 (!%p3631_p7), 1, %s2985_s22   ;;  %p3632_p10 = scmp.ne.s32.totalorder (!%p3631_p7), %s3612_s27, 0 }
  0x95   : > { %314 = sbr.rel (%p3631_p7) target bundleno = 4189 (0x105d), region = 44  ;;  %s3278_s16 = sshll.u32 (!%p3631_p7), %s3275_s4, 3 }
  0x96   : > { %s317_s20 = scalar_lea.sflag (!%p3631_p7), [#allocation3], %s3275_s4  ;;  %s320_s30 = scalar_lea.vmem (!%p3631_p7), [#allocation2], %s3278_s16 }
  0x9a   : > { %2960 = dma.done.wait (%p3632_p10), %s317_s20, 128  }
  0x9b   : > { %2962 = vsyncadd (%p3632_p10), %s317_s20, 4294967168  ;;  %s325_s29 = sand.u32 1, %s3069_s25   ;;  %s329_s26 = scalar_lea.vmem [#allocation5], %s3278_s16 }
  0x9c   : > { %s326_s14 = scalar_lea.sflag [#allocation6], %s325_s29 }
  0x9d   : > { %2964 = dma.done.wait (%p3632_p10), %s326_s14, 384  }
  0x9e   : > { %2966 = vsyncadd (%p3632_p10), %s326_s14, 4294966912  ;;  %s2287_s19 = sshll.u32 %s3275_s4, 4  ;;  %s344_s10 = scalar_lea.sflag [#allocation9], %s325_s29 }
  0x9f   : > { %s3293_s8 = scalar_lea.vmem [#allocation7], %s2287_s19  ;;  %s3295_s1 = scalar_lea.vmem [#allocation8], %s2287_s19 }
  0xa0   : > { %2968 = dma.done.wait (%p3632_p10), %s344_s10, 256  }
  0xa1   : > { %2970 = vsyncadd (%p3632_p10), %s344_s10, 4294967040  ;;  %p3633_p11 = scmp.eq.s32.totalorder %s3069_s25, 0 }
  0xa3   : > { %2972 = dma.done.wait (%p3633_p11), [#allocation9], 2816   ;;  %p3634_p12 = pmov %p3633_p11 }
  0xa4   : > { %v3004_v0 = vmov 0.0   ;;  %vm3005_vm0 = vmmov 0   ;;  %v2719_v1 = vld [vmem:[#allocation10 + $0x8] sm:$0xff]   ;;  %v2720_v2 = vld [vmem:[#allocation10 + $0x18] sm:$0xff]   ;;  %v2721_v3 = vld [vmem:[#allocation10] sm:$0xff]   ;;  %vm426_vm1 = vcmask 261120  }
  0xa5   : > { %2974 = vsyncadd (%p3634_p12), [#allocation9], 4294964480  ;;  %2425 = vmatprep.subr.bf16.mxu0 %v3004_v0  ;;  %2433 = vmatprep.subr.bf16.mxu1 %v3004_v0  ;;  %v2722_v4 = vld [vmem:[#allocation10 + $0x10] sm:$0xff]   ;;  %v3313_v5 = vld [vmem:[%s320_s30] sm:$0xff]  ;;  %s3006_s17 = smov 120   ;;  %vm634_vm2 = vcmask 64512  }
  0xa6   : > { %2429 = vmatprep.mubr.msk.bf16.mxu0 %vm3005_vm0, %v3004_v0  ;;  %2437 = vmatprep.mubr.msk.bf16.mxu1 %vm3005_vm0, %v3004_v0  ;;  %v399_v6 = vld [vmem:[%s329_s26] sm:$0xff]  ;;  %v404_v7 = vpack.c.bf16 %v3313_v5, %v3313_v5  ;;  %v2723_v9 = vld [vmem:[#allocation10 + $0x28] sm:$0xff]   ;;  %v2724_v10 = vld [vmem:[#allocation10 + $0x20] sm:$0xff]   ;;  %s3007_s7 = smov 104   ;;  %s3008_s13 = smov 112   ;;  %vm874_vm3 = vcmask 1043456  }
  0xa7   : > { %2426 = vmatpush3.bf16.msra.mxu0 %v2719_v1  ;;  %2434 = vmatpush3.bf16.msra.mxu1 %v2720_v2  ;;  %v470_v8 = vpack.c.bf16 %v399_v6, %v399_v6  ;;  %v2291_v11 = vld [vmem:[%s3595_s5] ss:$0 sm:$0xff]  ;;  %v2295_v12 = vld [vmem:[%s3595_s5 + $0x1] ss:$0 sm:$0xff]  ;;  %v2299_v33 = vld [vmem:[%s3595_s5 + $0x2] ss:$0 sm:$0xff] }
  0xa8   : > { %2427 = vmatprep.subr.bf16.mxu0 %v3004_v0  ;;  %2435 = vmatprep.subr.bf16.mxu1 %v3004_v0  ;;  %s3009_s28 = smov 8   ;;  %s3010_s20 = smov 16   ;;  %vm1069_vm4 = vcmask 130048   ;;  %vm1071_vm5 = vcmask 195584   ;;  %vm2040_vm6 = vcmask 523264  }
  0xa9   : > { %s3011_s30 = smov 24   ;;  %s2356_s27 = sshll.u32 %s3069_s25, 7 }
  0xaa   : > { %s394_s9 = scalar_lea.vmem [#allocation11], %s3278_s16  ;;  %p3635_p0 = scmp.ne.s32.totalorder %s3621_s18, 0 }
  0xab   : > { %2428 = vmatpush3.bf16.msra.mxu0 %v2721_v3  ;;  %2436 = vmatpush3.bf16.msra.mxu1 %v2722_v4  ;;  %s2125_s12 = sshll.u32 %s394_s9, 4  ;;  %s3012_s23 = smov [#allocation11]   ;;  %s2126_s12 = int_to_ptr.vmem [resolvable:$true] %s2125_s12 }
  0xac   : > { %2441 = vmatprep.subr.bf16.mxu0 %v3004_v0  ;;  %2449 = vmatprep.subr.bf16.mxu1 %v3004_v0 }
  0xae   : > { %2430 = vmatmul.mubr.msk.bf16.vlgmr.msra.gmra.mxu0 %vm426_vm1, %v404_v7  ;;  %2438 = vmatmul.mubr.msk.bf16.vlgmr.msra.gmra.mxu1 %vm426_vm1, %v470_v8 }
  0xaf   : > { %2445 = vmatprep.mubr.msk.bf16.mxu0 %vm3005_vm0, %v3004_v0  ;;  %2451 = vmatprep.mubr.msk.bf16.mxu1 %vm3005_vm0, %v3004_v0 }
  0xb0   : > { %2442 = vmatpush3.bf16.msra.mxu0 %v2723_v9 }
  0xb1   : > { %2443 = vmatprep.subr.bf16.mxu0 %v3004_v0 }
  0xb4   : > { %2444 = vmatpush3.bf16.msra.mxu0 %v2724_v10 }
  0xb5   : > { %2455 = vmatprep.subr.bf16.mxu0 %v3004_v0 }
  0xb7   : > { %2446 = vmatmul.mubr.msk.bf16.vlgmr.msra.gmra.mxu0 %vm426_vm1, %v470_v8 }
  0xb8   : > { %2457 = vmatprep.mubr.msk.bf16.mxu0 %vm3005_vm0, %v3004_v0 }
 0x16e   : > { %v464_v13 = vpop.f32.mrf.mxu0  ;;  %v529_v15 = vpop.f32.mrf.mxu1 }
 0x16f   : > { %v465_v14 = vadd.f32 %v2291_v11, %v464_v13  ;;  %v530_v16 = vadd.f32 %v2295_v12, %v529_v15 }
 0x170   : > { %v2431_v17 = vpop.f32.mrf.mxu0  ;;  %v2439_v18 = vpop.f32.mrf.mxu1 }
 0x171   : > { %597 = vrot.lane.b32.xlu1 %v465_v14, %s3006_s17  ;;  %607 = vrot.lane.b32.xlu0 %v530_v16, %s3006_s17  ;;  %v630_v20 = vpack.c.bf16 %v530_v16, %v530_v16  ;;  %v626_v25 = vpack.c.bf16 %v465_v14, %v465_v14 }
 0x172   : > { %v467_v19 = vpop.f32.mrf.mxu0  ;;  %v532_v21 = vpop.f32.mrf.mxu1 }
 0x173   : > { %v639_v23 = vsel %vm634_vm2, %v630_v20, 0 }
 0x174   : > { %v2432_v22 = vpop.f32.mrf.mxu0  ;;  %v2440_v24 = vpop.f32.mrf.mxu1  ;;  %2450 = vmatpush3.bf16.xpose.msra.mxu1 %v639_v23 }
 0x175   : > { %613 = vrot.lane.b32.xlu1 %v530_v16, %s3007_s7  ;;  %610 = vrot.lane.b32.xlu0 %v530_v16, %s3008_s13 }
 0x176   : > { %2461 = vmatprep.subr.bf16.mxu1 %v3004_v0 }
 0x177   : > { %v590_v26 = vpop.f32.mrf.mxu0 }
 0x178   : > { %v3352_v38 = vadd.f32 %v2299_v33, %v590_v26 }
 0x179   : > { %603 = vrot.lane.b32.xlu1 %v465_v14, %s3007_s7  ;;  %600 = vrot.lane.b32.xlu0 %v465_v14, %s3008_s13  ;;  %v2447_v27 = vpop.f32.mrf.mxu0 }
 0x17a   : > { %v867_v42 = vpack.c.bf16 %v3352_v38, %v3352_v38 }
 0x17b   : > { %2452 = vmatmul.mubr.msk.bf16.vlgmr.msra.gmra.mxu1 %vm634_vm2, %v626_v25  ;;  %v593_v28 = vpop.f32.mrf.mxu0 }
 0x17c   : > { %2463 = vmatprep.mubr.msk.bf16.mxu1 %vm3005_vm0, %v3004_v0  ;;  %v876_v46 = vsel %vm874_vm3, %v867_v42, 0 }
 0x17d   : > { %v2448_v29 = vpop.f32.mrf.mxu0 }
 0x1e3   : > { %v598_v30 = vpop.permute.xlu1 %597  ;;  %v608_v31 = vpop.permute.xlu0 %607 }
 0x1e4   : > { %v631_v32 = vpack.c.bf16 %v608_v31, %v608_v31  ;;  %v627_v41 = vpack.c.bf16 %v598_v30, %v598_v30 }
 0x1e6   : > { %v685_v34 = vsel %vm634_vm2, %v631_v32, 0 }
 0x1e7   : > { %v611_v35 = vpop.permute.xlu0 %610  ;;  %2456 = vmatpush3.bf16.xpose.msra.mxu0 %v685_v34  ;;  %v614_v36 = vpop.permute.xlu1 %613 }
 0x1e8   : > { %v632_v37 = vpack.c.bf16 %v611_v35, %v611_v35  ;;  %2467 = vmatprep.subr.bf16.mxu0 %v3004_v0  ;;  %v633_v40 = vpack.c.bf16 %v614_v36, %v614_v36 }
 0x1ea   : > { %v731_v39 = vsel %vm634_vm2, %v632_v37, 0  ;;  %v777_v44 = vsel %vm634_vm2, %v633_v40, 0 }
 0x1eb   : > { %2462 = vmatpush3.bf16.xpose.msra.mxu1 %v731_v39  ;;  %v601_v43 = vpop.permute.xlu0 %600  ;;  %v604_v47 = vpop.permute.xlu1 %603 }
 0x1ec   : > { %2473 = vmatprep.subr.bf16.mxu1 %v3004_v0  ;;  %v628_v45 = vpack.c.bf16 %v601_v43, %v601_v43  ;;  %v629_v48 = vpack.c.bf16 %v604_v47, %v604_v47 }
 0x1ee   : > { %2458 = vmatmul.mubr.msk.bf16.vlgmr.msra.gmra.mxu0 %vm634_vm2, %v627_v41 }
 0x1ef   : > { %2468 = vmatpush3.bf16.xpose.msra.mxu0 %v777_v44  ;;  %2469 = vmatprep.mubr.msk.bf16.mxu0 %vm3005_vm0, %v3004_v0 }
 0x1f0   : > { %2479 = vmatprep.subr.bf16.mxu0 %v3004_v0 }
 0x1f2   : > { %2464 = vmatmul.mubr.msk.bf16.vlgmr.msra.gmra.mxu1 %vm634_vm2, %v628_v45 }
 0x1f3   : > { %2474 = vmatpush3.bf16.msra.mxu1 %v876_v46  ;;  %2475 = vmatprep.mubr.msk.bf16.mxu1 %vm3005_vm0, %v3004_v0 }
 0x1f4   : > { %2485 = vmatprep.subr.bf16.mxu1 %v3004_v0 }
 0x1f6   : > { %2470 = vmatmul.mubr.msk.bf16.vlgmr.msra.gmra.mxu0 %vm634_vm2, %v629_v48 }
 0x1f7   : > { %2481 = vmatprep.mubr.msk.bf16.mxu0 %vm3005_vm0, %v3004_v0 }
 0x23b   : > { %v675_v49 = vpop.f32.mrf.mxu1 }
 0x23c   : > { %v819_v50 = vsel %vm634_vm2, %v675_v49, -inf }
 0x23d   : > { %820 = vmax.xlane.f32.xlu0 %v819_v50  ;;  %v2453_v51 = vpop.f32.mrf.mxu1 }
 0x23f   : > { %v678_v52 = vpop.f32.mrf.mxu1 }
 0x241   : > { %v2454_v53 = vpop.f32.mrf.mxu1 }
 0x2ae   : > { %v721_v54 = vpop.f32.mrf.mxu0 }
 0x2af   : > { %v822_v55 = vsel %vm634_vm2, %v721_v54, -inf }
 0x2b0   : > { %823 = vmax.xlane.f32.xlu1 %v822_v55  ;;  %v2459_v56 = vpop.f32.mrf.mxu0 }
 0x2b1   : > { %v2725_v56 = vld [vmem:[#allocation10 + $0x38] sm:$0xff]  }
 0x2b2   : > { %v724_v57 = vpop.f32.mrf.mxu0  ;;  %v767_v58 = vpop.f32.mrf.mxu1 }
 0x2b3   : > { %v825_v59 = vsel %vm634_vm2, %v767_v58, -inf  ;;  %v2726_v57 = vld [vmem:[#allocation10 + $0x30] sm:$0xff]  }
 0x2b4   : > { %826 = vmax.xlane.f32.xlu0 %v825_v59  ;;  %v2460_v60 = vpop.f32.mrf.mxu0  ;;  %v2465_v61 = vpop.f32.mrf.mxu1 }
 0x2b6   : > { %v770_v62 = vpop.f32.mrf.mxu1  ;;  %v813_v63 = vpop.f32.mrf.mxu0 }
 0x2b7   : > { %v828_v1 = vsel %vm634_vm2, %v813_v63, -inf }
 0x2b8   : > { %v2466_v2 = vpop.f32.mrf.mxu1  ;;  %829 = vmax.xlane.f32.xlu0 %v828_v1  ;;  %v2471_v3 = vpop.f32.mrf.mxu0 }
 0x2ba   : > { %v816_v4 = vpop.f32.mrf.mxu0 }
 0x2bc   : > { %v2472_v6 = vpop.f32.mrf.mxu0 }
 0x2c1   : > { %617 = vrot.lane.b32.xlu1 %v3352_v38, %s3006_s17 }
 0x2c6   : > { %v821_v7 = vpop.xlane.xlu0 %820 }
 0x2c7   : > { %v831_v8 = vsub.f32 %v675_v49, %v821_v7 }
 0x2c9   : > { %v835_v9 = vmul.f32 1.442695, %v831_v8 }
 0x2cb   : > { %2741 = vpow2.f32 %v835_v9 }
 0x2d8   : > { %v2742_v10 = vpop.eup %2741 }
 0x2d9   : > { %v843_v11 = vsel %vm634_vm2, %v2742_v10, 0.0 }
 0x2e5   : > { %844 = vadd.xlane.f32.xlu1 %v843_v11 }
 0x339   : > { %v824_v12 = vpop.xlane.xlu1 %823 }
 0x33a   : > { %v832_v13 = vsub.f32 %v721_v54, %v824_v12 }
 0x33c   : > { %v837_v14 = vmul.f32 1.442695, %v832_v13 }
 0x33d   : > { %v827_v15 = vpop.xlane.xlu0 %826  ;;  %v618_v16 = vpop.permute.xlu1 %617 }
 0x33e   : > { %2743 = vpow2.f32 %v837_v14  ;;  %v833_v17 = vsub.f32 %v767_v58, %v827_v15  ;;  %v868_v18 = vpack.c.bf16 %v618_v16, %v618_v16  ;;  %v2311_v15 = vld [vmem:[%s3595_s5 + $0x3] ss:$0 sm:$0xff] }
 0x340   : > { %v839_v19 = vmul.f32 1.442695, %v833_v17  ;;  %v922_v20 = vsel %vm874_vm3, %v868_v18, 0 }
 0x341   : > { %2480 = vmatpush3.bf16.msra.mxu0 %v922_v20  ;;  %v830_v21 = vpop.xlane.xlu0 %829 }
 0x342   : > { %2745 = vpow2.f32 %v839_v19  ;;  %v834_v22 = vsub.f32 %v813_v63, %v830_v21  ;;  %2491 = vmatprep.subr.bf16.mxu0 %v3004_v0 }
 0x344   : > { %v841_v23 = vmul.f32 1.442695, %v834_v22 }
 0x346   : > { %2747 = vpow2.f32 %v841_v23  ;;  %v2727_v23 = vld [vmem:[#allocation10 + $0x58] sm:$0xff]  }
 0x34b   : > { %v2744_v24 = vpop.eup %2743 }
 0x34c   : > { %v846_v25 = vsel %vm634_vm2, %v2744_v24, 0.0 }
 0x34d   : > { %847 = vadd.xlane.f32.xlu0 %v846_v25 }
 0x34f   : > { %v2746_v26 = vpop.eup %2745 }
 0x350   : > { %v849_v27 = vsel %vm634_vm2, %v2746_v26, 0.0 }
 0x351   : > { %850 = vadd.xlane.f32.xlu1 %v849_v27 }
 0x353   : > { %v2748_v28 = vpop.eup %2747 }
 0x354   : > { %v852_v29 = vsel %vm634_vm2, %v2748_v28, 0.0 }
 0x355   : > { %853 = vadd.xlane.f32.xlu0 %v852_v29  ;;  %v400_v29 = vld [vmem:[%s3293_s8] sm:$0xff] }
 0x362   : > { %623 = vrot.lane.b32.xlu1 %v3352_v38, %s3007_s7 }
 0x36b   : > { %620 = vrot.lane.b32.xlu0 %v3352_v38, %s3008_s13 }
 0x36e   : > { %v845_v30 = vpop.xlane.xlu1 %844 }
 0x36f   : > { %2749 = vrcp.f32 %v845_v30  ;;  %v401_v30 = vld [vmem:[%s3293_s8 + $0x8] sm:$0xff] }
 0x37c   : > { %v2750_v31 = vpop.eup %2749 }
 0x37d   : > { %v859_v32 = vmul.f32 %v2750_v31, %v2742_v10  ;;  %v402_v31 = vld [vmem:[%s3295_s1] sm:$0xff] }
 0x37f   : > { %v863_v33 = vpack.c.bf16 %v859_v32, %v859_v32  ;;  %v403_v32 = vld [vmem:[%s3295_s1 + $0x8] sm:$0xff] }
 0x381   : > { %2476 = vmatmul.mubr.msk.bf16.vlgmr.msra.gmra.mxu1 %vm634_vm2, %v863_v33  ;;  %v1230_v33 = vadd.f32 %v402_v31, %v400_v29 }
 0x382   : > { %2487 = vmatprep.mubr.msk.bf16.mxu1 %vm3005_vm0, %v3004_v0 }
 0x3d6   : > { %v848_v34 = vpop.xlane.xlu0 %847 }
 0x3d7   : > { %2751 = vrcp.f32 %v848_v34  ;;  %v1231_v34 = vadd.f32 %v403_v32, %v401_v30 }
 0x3da   : > { %v851_v35 = vpop.xlane.xlu1 %850 }
 0x3db   : > { %2753 = vrcp.f32 %v851_v35  ;;  %v1232_v35 = vpack.c.bf16 %v1231_v34, %v1230_v33 }
 0x3de   : > { %v854_v36 = vpop.xlane.xlu0 %853  ;;  %v624_v37 = vpop.permute.xlu1 %623 }
 0x3df   : > { %2755 = vrcp.f32 %v854_v36  ;;  %v870_v41 = vpack.c.bf16 %v624_v37, %v624_v37  ;;  %v2729_v36 = vld [vmem:[#allocation10 + $0x48] sm:$0xff]   ;;  %v2730_v37 = vld [vmem:[#allocation10 + $0x40] sm:$0xff]  }
 0x3e1   : > { %v1014_v46 = vsel %vm874_vm3, %v870_v41, 0 }
 0x3e2   : > { %v621_v39 = vpop.permute.xlu0 %620 }
 0x3e3   : > { %v869_v40 = vpack.c.bf16 %v621_v39, %v621_v39 }
 0x3e4   : > { %v2752_v38 = vpop.eup %2751 }
 0x3e5   : > { %v968_v42 = vsel %vm874_vm3, %v869_v40, 0  ;;  %v860_v43 = vmul.f32 %v2752_v38, %v2744_v24  ;;  %v2728_v24 = vld [vmem:[#allocation10 + $0x50] sm:$0xff]  }
 0x3e6   : > { %2486 = vmatpush3.bf16.msra.mxu1 %v968_v42  ;;  %v2315_v42 = vld [vmem:[%s3595_s5 + $0xa] ss:$0 sm:$0xff] }
 0x3e7   : > { %v864_v44 = vpack.c.bf16 %v860_v43, %v860_v43  ;;  %2497 = vmatprep.subr.bf16.mxu1 %v3004_v0 }
 0x3e8   : > { %v2754_v45 = vpop.eup %2753 }
 0x3e9   : > { %2482 = vmatmul.mubr.msk.bf16.vlgmr.msra.gmra.mxu0 %vm634_vm2, %v864_v44  ;;  %v861_v47 = vmul.f32 %v2754_v45, %v2746_v26  ;;  %v2316_v44 = vld [vmem:[%s3595_s5 + $0xb] ss:$0 sm:$0xff] }
 0x3ea   : > { %2492 = vmatpush3.bf16.msra.mxu0 %v1014_v46  ;;  %2493 = vmatprep.mubr.msk.bf16.mxu0 %vm3005_vm0, %v3004_v0 }
 0x3eb   : > { %v865_v48 = vpack.c.bf16 %v861_v47, %v861_v47  ;;  %2505 = vmatprep.subr.bf16.mxu0 %v3004_v0 }
 0x3ec   : > { %v2756_v49 = vpop.eup %2755 }
 0x3ed   : > { %2488 = vmatmul.mubr.msk.bf16.vlgmr.msra.gmra.mxu1 %vm634_vm2, %v865_v48  ;;  %v862_v50 = vmul.f32 %v2756_v49, %v2748_v28  ;;  %v2321_v48 = vld [vmem:[%s3595_s5 + $0x5] ss:$0 sm:$0xff] }
 0x3ee   : > { %2501 = vmatprep.mubr.msk.bf16.mxu1 %vm3005_vm0, %v3004_v0  ;;  %2498 = vmatpush3.bf16.msra.mxu1 %v2725_v56 }
 0x3ef   : > { %v866_v51 = vpack.c.bf16 %v862_v50, %v862_v50  ;;  %2499 = vmatprep.subr.bf16.mxu1 %v3004_v0 }
 0x3f1   : > { %2494 = vmatmul.mubr.msk.bf16.vlgmr.msra.gmra.mxu0 %vm634_vm2, %v866_v51 }
 0x3f2   : > { %2509 = vmatprep.mubr.msk.bf16.mxu0 %vm3005_vm0, %v3004_v0  ;;  %2500 = vmatpush3.bf16.msra.mxu1 %v2726_v57 }
 0x3f3   : > { %2513 = vmatprep.subr.bf16.mxu1 %v3004_v0  ;;  %2506 = vmatpush3.bf16.msra.mxu0 %v2729_v36 }
 0x3f4   : > { %2507 = vmatprep.subr.bf16.mxu0 %v3004_v0 }
 0x3f7   : > { %2508 = vmatpush3.bf16.msra.mxu0 %v2730_v37 }
 0x3f8   : > { %2521 = vmatprep.subr.bf16.mxu0 %v3004_v0 }
 0x441   : > { %v912_v52 = vpop.f32.mrf.mxu1 }
 0x443   : > { %v2477_v53 = vpop.f32.mrf.mxu1 }
 0x445   : > { %v915_v54 = vpop.f32.mrf.mxu1 }
 0x447   : > { %v2478_v55 = vpop.f32.mrf.mxu1 }
 0x4a9   : > { %v958_v58 = vpop.f32.mrf.mxu0 }
 0x4aa   : > { %1057 = vrot.lane.b32.xlu1 %v958_v58, %s3009_s28  ;;  %v2731_v58 = vld [vmem:[#allocation10 + $0x68] sm:$0xff]  }
 0x4ab   : > { %v2483_v59 = vpop.f32.mrf.mxu0 }
 0x4ac   : > { %v2732_v59 = vld [vmem:[#allocation10 + $0x60] sm:$0xff]  }
 0x4ad   : > { %v961_v60 = vpop.f32.mrf.mxu0  ;;  %v1004_v61 = vpop.f32.mrf.mxu1 }
 0x4ae   : > { %1061 = vrot.lane.b32.xlu0 %v1004_v61, %s3010_s20  ;;  %v1298_v60 = vpack.c.bf16 %v401_v30, %v400_v29 }
 0x4af   : > { %v2484_v62 = vpop.f32.mrf.mxu0  ;;  %v2489_v63 = vpop.f32.mrf.mxu1 }
 0x4b1   : > { %v1007_v1 = vpop.f32.mrf.mxu1  ;;  %v1050_v2 = vpop.f32.mrf.mxu0 }
 0x4b2   : > { %1065 = vrot.lane.b32.xlu1 %v1050_v2, %s3011_s30 }
 0x4b3   : > { %v2490_v3 = vpop.f32.mrf.mxu1  ;;  %v2495_v4 = vpop.f32.mrf.mxu0 }
 0x4b5   : > { %v1053_v6 = vpop.f32.mrf.mxu0 }
 0x4b7   : > { %v2496_v7 = vpop.f32.mrf.mxu0 }
 0x4b8   : > { %v2317_v7 = vld [vmem:[%s3595_s5 + $0x4] ss:$0 sm:$0xff] }
 0x51c   : > { %v1058_v8 = vpop.permute.xlu1 %1057 }
 0x51d   : > { %v1068_v10 = vsel %vm634_vm2, %v912_v52, %v1058_v8 }
 0x520   : > { %v1062_v9 = vpop.permute.xlu0 %1061 }
 0x521   : > { %v1070_v11 = vsel %vm1069_vm4, %v1068_v10, %v1062_v9 }
 0x524   : > { %v1066_v12 = vpop.permute.xlu1 %1065 }
 0x525   : > { %v1072_v13 = vsel %vm1071_vm5, %v1070_v11, %v1066_v12 }
 0x526   : > { %v1073_v14 = vpack.c.bf16 %v1072_v13, %v1072_v13 }
 0x528   : > { %2502 = vmatmul.mubr.msk.bf16.vlgmr.msra.gmra.mxu1 %vm426_vm1, %v1073_v14 }
 0x529   : > { %2517 = vmatprep.mubr.msk.bf16.mxu1 %vm3005_vm0, %v3004_v0  ;;  %2514 = vmatpush3.bf16.msra.mxu1 %v2727_v23  ;;  %v2325_v23 = vld [vmem:[%s3595_s5 + $0x6] ss:$0 sm:$0xff] }
 0x52a   : > { %2515 = vmatprep.subr.bf16.mxu1 %v3004_v0 }
 0x52d   : > { %2516 = vmatpush3.bf16.msra.mxu1 %v2728_v24 }
 0x52e   : > { %2529 = vmatprep.subr.bf16.mxu1 %v3004_v0 }
 0x530   : > { %2518 = vmatmul.mubr.msk.bf16.vlgmr.msra.gmra.mxu1 %vm426_vm1, %v1232_v35 }
 0x531   : > { %2531 = vmatprep.mubr.msk.bf16.mxu1 %vm3005_vm0, %v3004_v0 }
 0x5e8   : > { %v1132_v16 = vpop.f32.mrf.mxu1 }
 0x5e9   : > { %v1133_v17 = vadd.f32 %v2311_v15, %v1132_v16 }
 0x5ea   : > { %v2503_v18 = vpop.f32.mrf.mxu1 }
 0x5eb   : > { %v1138_v19 = vadd.f32 %v1133_v17, %v3313_v5 }
 0x5ec   : > { %v1135_v20 = vpop.f32.mrf.mxu1 }
 0x5ed   : > { %v1139_v21 = vsel %vm426_vm1, %v1138_v19, 0.0 }
 0x5ee   : > { %1140 = vadd.xlane.f32.xlu0 %v1139_v21  ;;  %v2504_v22 = vpop.f32.mrf.mxu1 }
 0x5f0   : > { %v1291_v49 = vpop.f32.mrf.mxu1 }
 0x5f1   : > { %v1292_v51 = vadd.f32 %v2321_v48, %v1291_v49 }
 0x5f2   : > { %v2519_v50 = vpop.f32.mrf.mxu1 }
 0x5f4   : > { %v1294_v52 = vpop.f32.mrf.mxu1 }
 0x5f5   : > { %v1295_v53 = vadd.f32 %v2321_v48, %v1294_v52 }
 0x5f6   : > { %v2520_v54 = vpop.f32.mrf.mxu1 }
 0x5f7   : > { %v2694_v55 = vpack.i.bf16 %v1295_v53, %v1292_v51  ;;  %v1418_v56 = vpack.c.bf16 %v1295_v53, %v1292_v51 }
 0x5f9   : > { %v1426_v57 = vsel %vm634_vm2, %v1418_v56, 0 }
 0x5fa   : > { %2530 = vmatpush3.bf16.xpose.msra.mxu1 %v1426_v57 }
 0x5fb   : > { %2541 = vmatprep.subr.bf16.mxu1 %v3004_v0 }
 0x604   : > { %2690 = vrot.lane.b32.xlu0 %v2694_v55, %s3006_s17 }
 0x677   : > { %v1141_v25 = vpop.xlane.xlu0 %1140 }
 0x678   : > { %v1143_v26 = vmul.f32 0.03125, %v1141_v25 }
 0x67a   : > { %v1144_v5 = vsub.f32 %v1138_v19, %v1143_v26 }
 0x67b   : > { %v2691_v61 = vpop.permute.xlu0 %2690 }
 0x67c   : > { %v1145_v27 = vmul.f32 %v1144_v5, %v1144_v5  ;;  %v2693_v62 = vunpack.i.h.bf16 %v2691_v61  ;;  %v2692_v63 = vunpack.i.l.bf16 %v2691_v61 }
 0x67e   : > { %v1146_v28 = vsel %vm426_vm1, %v1145_v27, 0.0  ;;  %v1419_v1 = vpack.c.bf16 %v2693_v62, %v2692_v63 }
 0x67f   : > { %1147 = vadd.xlane.f32.xlu1 %v1146_v28 }
 0x680   : > { %v1472_v2 = vsel %vm634_vm2, %v1419_v1, 0 }
 0x690   : > { %2695 = vrot.lane.b32.xlu1 %v2694_v55, %s3008_s13 }
 0x694   : > { %2700 = vrot.lane.b32.xlu1 %v2694_v55, %s3007_s7 }
 0x708   : > { %v1148_v39 = vpop.xlane.xlu1 %1147 }
 0x709   : > { %v1149_v40 = vmul.f32 0.03125, %v1148_v39 }
 0x70b   : > { %v1150_v38 = vadd.f32 1e-05, %v1149_v40 }
 0x70c   : > { %v2696_v3 = vpop.permute.xlu1 %2695 }
 0x70d   : > { %2757 = vrsqrt.f32 %v1150_v38  ;;  %v2698_v4 = vunpack.i.h.bf16 %v2696_v3  ;;  %v2697_v6 = vunpack.i.l.bf16 %v2696_v3 }
 0x70f   : > { %v1420_v8 = vpack.c.bf16 %v2698_v4, %v2697_v6 }
 0x710   : > { %v2701_v20 = vpop.permute.xlu1 %2700 }
 0x711   : > { %v1518_v13 = vsel %vm634_vm2, %v1420_v8, 0  ;;  %v2703_v21 = vunpack.i.h.bf16 %v2701_v20  ;;  %v2702_v22 = vunpack.i.l.bf16 %v2701_v20 }
 0x713   : > { %v1421_v24 = vpack.c.bf16 %v2703_v21, %v2702_v22 }
 0x715   : > { %v1564_v28 = vsel %vm634_vm2, %v1421_v24, 0 }
 0x71a   : > { %v2758_v41 = vpop.eup %2757 }
 0x71b   : > { %v1152_v43 = vmul.f32 %v2758_v41, %v1144_v5 }
 0x71d   : > { %v1158_v45 = vmul.f32 %v2315_v42, %v1152_v43 }
 0x71f   : > { %v3437_v46 = vadd.f32 %v2316_v44, %v1158_v45 }
 0x721   : > { %v1165_v47 = vpack.c.bf16 %v3437_v46, %v3437_v46 }
 0x723   : > { %2510 = vmatmul.mubr.msk.bf16.vlgmr.msra.gmra.mxu0 %vm426_vm1, %v1165_v47 }
 0x724   : > { %2525 = vmatprep.mubr.msk.bf16.mxu0 %vm3005_vm0, %v3004_v0  ;;  %2522 = vmatpush3.bf16.msra.mxu0 %v2731_v58 }
 0x725   : > { %2523 = vmatprep.subr.bf16.mxu0 %v3004_v0 }
 0x728   : > { %2524 = vmatpush3.bf16.msra.mxu0 %v2732_v59 }
 0x729   : > { %2535 = vmatprep.subr.bf16.mxu0 %v3004_v0 }
 0x72b   : > { %2526 = vmatmul.mubr.msk.bf16.vlgmr.msra.gmra.mxu0 %vm426_vm1, %v1298_v60 }
 0x72c   : > { %2537 = vmatprep.mubr.msk.bf16.mxu0 %vm3005_vm0, %v3004_v0  ;;  %2536 = vmatpush3.bf16.xpose.msra.mxu0 %v1472_v2 }
 0x72d   : > { %2547 = vmatprep.subr.bf16.mxu0 %v3004_v0 }
 0x7e3   : > { %v1224_v9 = vpop.f32.mrf.mxu0 }
 0x7e4   : > { %v1225_v10 = vadd.f32 %v2317_v7, %v1224_v9 }
 0x7e5   : > { %v2511_v11 = vpop.f32.mrf.mxu0 }
 0x7e6   : > { %v1414_v12 = vpack.c.bf16 %v1225_v10, %v1225_v10  ;;  %1371 = vrot.lane.b32.xlu1 %v1225_v10, %s3007_s7  ;;  %1365 = vrot.lane.b32.xlu0 %v1225_v10, %s3006_s17 }
 0x7e7   : > { %v1227_v14 = vpop.f32.mrf.mxu0 }
 0x7e8   : > { %2532 = vmatmul.mubr.msk.bf16.vlgmr.msra.gmra.mxu1 %vm634_vm2, %v1414_v12 }
 0x7e9   : > { %v2512_v15 = vpop.f32.mrf.mxu0  ;;  %2542 = vmatpush3.bf16.xpose.msra.mxu1 %v1518_v13  ;;  %2543 = vmatprep.mubr.msk.bf16.mxu1 %vm3005_vm0, %v3004_v0 }
 0x7ea   : > { %1368 = vrot.lane.b32.xlu0 %v1225_v10, %s3008_s13  ;;  %2553 = vmatprep.subr.bf16.mxu1 %v3004_v0 }
 0x7eb   : > { %v1357_v16 = vpop.f32.mrf.mxu0 }
 0x7ec   : > { %v1358_v26 = vadd.f32 %v2325_v23, %v1357_v16 }
 0x7ed   : > { %v2527_v17 = vpop.f32.mrf.mxu0 }
 0x7ef   : > { %v1360_v18 = vpop.f32.mrf.mxu0 }
 0x7f0   : > { %v1361_v5 = vadd.f32 %v2325_v23, %v1360_v18 }
 0x7f1   : > { %v2528_v19 = vpop.f32.mrf.mxu0 }
 0x7f2   : > { %v1654_v30 = vpack.c.bf16 %v1361_v5, %v1358_v26  ;;  %v2704_v55 = vpack.i.bf16 %v1361_v5, %v1358_v26 }
 0x858   : > { %v1366_v25 = vpop.permute.xlu0 %1365  ;;  %v1372_v32 = vpop.permute.xlu1 %1371 }
 0x859   : > { %v1415_v27 = vpack.c.bf16 %v1366_v25, %v1366_v25  ;;  %v1417_v33 = vpack.c.bf16 %v1372_v32, %v1372_v32 }
 0x85b   : > { %2538 = vmatmul.mubr.msk.bf16.vlgmr.msra.gmra.mxu0 %vm634_vm2, %v1415_v27 }
 0x85c   : > { %2548 = vmatpush3.bf16.xpose.msra.mxu0 %v1564_v28  ;;  %v1369_v29 = vpop.permute.xlu0 %1368  ;;  %2549 = vmatprep.mubr.msk.bf16.mxu0 %vm3005_vm0, %v3004_v0 }
 0x85d   : > { %v1416_v31 = vpack.c.bf16 %v1369_v29, %v1369_v29  ;;  %2559 = vmatprep.subr.bf16.mxu0 %v3004_v0 }
 0x85f   : > { %2544 = vmatmul.mubr.msk.bf16.vlgmr.msra.gmra.mxu1 %vm634_vm2, %v1416_v31 }
 0x860   : > { %2554 = vmatpush3.bf16.msra.mxu1 %v1654_v30  ;;  %2555 = vmatprep.mubr.msk.bf16.mxu1 %vm3005_vm0, %v3004_v0 }
 0x861   : > { %2565 = vmatprep.subr.bf16.mxu1 %v3004_v0 }
 0x863   : > { %2550 = vmatmul.mubr.msk.bf16.vlgmr.msra.gmra.mxu0 %vm634_vm2, %v1417_v33 }
 0x864   : > { %2561 = vmatprep.mubr.msk.bf16.mxu0 %vm3005_vm0, %v3004_v0 }
 0x8a8   : > { %v1462_v34 = vpop.f32.mrf.mxu1 }
 0x8a9   : > { %v1606_v35 = vsel %vm1069_vm4, %v1462_v34, -inf }
 0x8aa   : > { %1607 = vmax.xlane.f32.xlu0 %v1606_v35  ;;  %v2533_v36 = vpop.f32.mrf.mxu1 }
 0x8ac   : > { %v1465_v37 = vpop.f32.mrf.mxu1 }
 0x8ae   : > { %v2534_v39 = vpop.f32.mrf.mxu1 }
 0x91b   : > { %v1508_v40 = vpop.f32.mrf.mxu0 }
 0x91c   : > { %v1609_v38 = vsel %vm1069_vm4, %v1508_v40, -inf }
 0x91d   : > { %1610 = vmax.xlane.f32.xlu1 %v1609_v38  ;;  %v2539_v41 = vpop.f32.mrf.mxu0 }
 0x91f   : > { %v1511_v42 = vpop.f32.mrf.mxu0  ;;  %v1554_v43 = vpop.f32.mrf.mxu1 }
 0x920   : > { %v1612_v44 = vsel %vm1069_vm4, %v1554_v43, -inf }
 0x921   : > { %1613 = vmax.xlane.f32.xlu0 %v1612_v44  ;;  %v2540_v45 = vpop.f32.mrf.mxu0  ;;  %v2545_v47 = vpop.f32.mrf.mxu1 }
 0x922   : > { %v2733_v45 = vld [vmem:[#allocation10 + $0x78] sm:$0xff]   ;;  %v2734_v47 = vld [vmem:[#allocation10 + $0x70] sm:$0xff]  }
 0x923   : > { %v1557_v48 = vpop.f32.mrf.mxu1  ;;  %v1600_v49 = vpop.f32.mrf.mxu0 }
 0x924   : > { %v1615_v50 = vsel %vm1069_vm4, %v1600_v49, -inf }
 0x925   : > { %v2546_v51 = vpop.f32.mrf.mxu1  ;;  %1616 = vmax.xlane.f32.xlu0 %v1615_v50  ;;  %v2551_v52 = vpop.f32.mrf.mxu0 }
 0x927   : > { %v1603_v53 = vpop.f32.mrf.mxu0 }
 0x929   : > { %v2552_v54 = vpop.f32.mrf.mxu0 }
 0x92e   : > { %2705 = vrot.lane.b32.xlu1 %v2704_v55, %s3006_s17  ;;  %s2123_s17 = scalar_lea.hbm %s3596_s6, %s2356_s27 }
 0x933   : > { %v1608_v56 = vpop.xlane.xlu0 %1607 }
 0x934   : > { %v1618_v57 = vsub.f32 %v1462_v34, %v1608_v56 }
 0x936   : > { %v1622_v58 = vmul.f32 1.442695, %v1618_v57 }
 0x938   : > { %2759 = vpow2.f32 %v1622_v58 }
 0x945   : > { %v2760_v59 = vpop.eup %2759 }
 0x946   : > { %v1630_v60 = vsel %vm1069_vm4, %v2760_v59, 0.0 }
 0x952   : > { %1631 = vadd.xlane.f32.xlu1 %v1630_v60 }
 0x9a6   : > { %v1611_v61 = vpop.xlane.xlu1 %1610 }
 0x9a7   : > { %v1619_v62 = vsub.f32 %v1508_v40, %v1611_v61 }
 0x9a9   : > { %v1624_v63 = vmul.f32 1.442695, %v1619_v62 }
 0x9aa   : > { %v1614_v1 = vpop.xlane.xlu0 %1613  ;;  %v2706_v2 = vpop.permute.xlu1 %2705 }
 0x9ab   : > { %2761 = vpow2.f32 %v1624_v63  ;;  %v1620_v3 = vsub.f32 %v1554_v43, %v1614_v1  ;;  %v2708_v4 = vunpack.i.h.bf16 %v2706_v2  ;;  %v2707_v6 = vunpack.i.l.bf16 %v2706_v2 }
 0x9ad   : > { %v1626_v7 = vmul.f32 1.442695, %v1620_v3  ;;  %v1655_v8 = vpack.c.bf16 %v2708_v4, %v2707_v6  ;;  %v2337_v4 = vld [vmem:[%s3595_s5 + $0x7] ss:$0 sm:$0xff] }
 0x9ae   : > { %v1617_v9 = vpop.xlane.xlu0 %1616 }
 0x9af   : > { %2763 = vpow2.f32 %v1626_v7  ;;  %v1621_v10 = vsub.f32 %v1600_v49, %v1617_v9  ;;  %2560 = vmatpush3.bf16.msra.mxu0 %v1655_v8 }
 0x9b0   : > { %2571 = vmatprep.subr.bf16.mxu0 %v3004_v0 }
 0x9b1   : > { %v1628_v11 = vmul.f32 1.442695, %v1621_v10 }
 0x9b3   : > { %2765 = vpow2.f32 %v1628_v11 }
 0x9b8   : > { %v2762_v12 = vpop.eup %2761 }
 0x9b9   : > { %v1633_v13 = vsel %vm1069_vm4, %v2762_v12, 0.0 }
 0x9ba   : > { %1634 = vadd.xlane.f32.xlu0 %v1633_v13 }
 0x9bc   : > { %v2764_v14 = vpop.eup %2763 }
 0x9bd   : > { %v1636_v15 = vsel %vm1069_vm4, %v2764_v14, 0.0 }
 0x9be   : > { %1637 = vadd.xlane.f32.xlu1 %v1636_v15 }
 0x9c0   : > { %v2766_v16 = vpop.eup %2765 }
 0x9c1   : > { %v1639_v17 = vsel %vm1069_vm4, %v2766_v16, 0.0 }
 0x9c2   : > { %1640 = vadd.xlane.f32.xlu0 %v1639_v17 }
 0x9cf   : > { %2715 = vrot.lane.b32.xlu1 %v2704_v55, %s3007_s7  ;;  %s2112_s7 = scalar_lea.sflag [#allocation4], %s3275_s4 }
 0x9d8   : > { %2710 = vrot.lane.b32.xlu0 %v2704_v55, %s3008_s13  ;;  %s2917_s13 = scalar_lea.vmem %s2126_s12, 128 }
 0x9d9   : > { %p2918_p13 = scmp.ne.s32.totalorder %s2126_s12, %s2917_s13 }
 0x9db   : > { %v1632_v18 = vpop.xlane.xlu1 %1631  ;;  %p2919_p5 = pnand %p2918_p13, %p3635_p0 }
 0x9dc   : > { %2767 = vrcp.f32 %v1632_v18  ;;  %v2735_v18 = vld [vmem:[#allocation10 + $0x88] sm:$0xff]  }
 0x9dd   : > { %p2920_p9 = pneg %p2919_p5 }
 0x9e9   : > { %v2768_v19 = vpop.eup %2767 }
 0x9ea   : > { %v1646_v20 = vmul.f32 %v2768_v19, %v2760_v59  ;;  %v2736_v19 = vld [vmem:[#allocation10 + $0x80] sm:$0xff]  }
 0x9ec   : > { %v1650_v21 = vpack.c.bf16 %v1646_v20, %v1646_v20  ;;  %v2737_v20 = vld [vmem:[#allocation10 + $0xa8] sm:$0xff]  }
 0x9ee   : > { %2556 = vmatmul.mubr.msk.bf16.vlgmr.msra.gmra.mxu1 %vm1069_vm4, %v1650_v21 }
 0x9ef   : > { %2567 = vmatprep.mubr.msk.bf16.mxu1 %vm3005_vm0, %v3004_v0 }
 0xa43   : > { %v1635_v22 = vpop.xlane.xlu0 %1634 }
 0xa44   : > { %2769 = vrcp.f32 %v1635_v22 }
 0xa47   : > { %v1638_v23 = vpop.xlane.xlu1 %1637 }
 0xa48   : > { %2771 = vrcp.f32 %v1638_v23 }
 0xa4b   : > { %v1641_v24 = vpop.xlane.xlu0 %1640  ;;  %v2716_v25 = vpop.permute.xlu1 %2715 }
 0xa4c   : > { %2773 = vrcp.f32 %v1641_v24  ;;  %v2718_v29 = vunpack.i.h.bf16 %v2716_v25  ;;  %v2717_v30 = vunpack.i.l.bf16 %v2716_v25  ;;  %v2341_v25 = vld [vmem:[%s3595_s5 + $0xc] ss:$0 sm:$0xff] }
 0xa4e   : > { %v1657_v35 = vpack.c.bf16 %v2718_v29, %v2717_v30  ;;  %v2739_v30 = vld [vmem:[#allocation10 + $0x98] sm:$0xff]  }
 0xa4f   : > { %v2711_v26 = vpop.permute.xlu0 %2710 }
 0xa50   : > { %v2713_v5 = vunpack.i.h.bf16 %v2711_v26  ;;  %v2712_v27 = vunpack.i.l.bf16 %v2711_v26 }
 0xa51   : > { %v2770_v28 = vpop.eup %2769 }
 0xa52   : > { %v1656_v31 = vpack.c.bf16 %v2713_v5, %v2712_v27  ;;  %v1647_v32 = vmul.f32 %v2770_v28, %v2762_v12  ;;  %v2342_v5 = vld [vmem:[%s3595_s5 + $0xd] ss:$0 sm:$0xff] }
 0xa54   : > { %2566 = vmatpush3.bf16.msra.mxu1 %v1656_v31  ;;  %v1651_v33 = vpack.c.bf16 %v1647_v32, %v1647_v32  ;;  %v2740_v31 = vld [vmem:[#allocation10 + $0x90] sm:$0xff]   ;;  %v2343_v32 = vld [vmem:[%s3595_s5 + $0x8] ss:$0 sm:$0xff] }
 0xa55   : > { %v2772_v34 = vpop.eup %2771  ;;  %2577 = vmatprep.subr.bf16.mxu1 %v3004_v0 }
 0xa56   : > { %2562 = vmatmul.mubr.msk.bf16.vlgmr.msra.gmra.mxu0 %vm1069_vm4, %v1651_v33  ;;  %v1648_v36 = vmul.f32 %v2772_v34, %v2764_v14 }
 0xa57   : > { %2572 = vmatpush3.bf16.msra.mxu0 %v1657_v35  ;;  %2573 = vmatprep.mubr.msk.bf16.mxu0 %vm3005_vm0, %v3004_v0 }
 0xa58   : > { %v1652_v37 = vpack.c.bf16 %v1648_v36, %v1648_v36  ;;  %2585 = vmatprep.subr.bf16.mxu0 %v3004_v0 }
 0xa59   : > { %v2774_v39 = vpop.eup %2773 }
 0xa5a   : > { %2568 = vmatmul.mubr.msk.bf16.vlgmr.msra.gmra.mxu1 %vm1069_vm4, %v1652_v37  ;;  %v1649_v40 = vmul.f32 %v2774_v39, %v2766_v16 }
 0xa5b   : > { %2581 = vmatprep.mubr.msk.bf16.mxu1 %vm3005_vm0, %v3004_v0  ;;  %2578 = vmatpush3.bf16.msra.mxu1 %v2733_v45 }
 0xa5c   : > { %v1653_v38 = vpack.c.bf16 %v1649_v40, %v1649_v40  ;;  %2579 = vmatprep.subr.bf16.mxu1 %v3004_v0 }
 0xa5e   : > { %2574 = vmatmul.mubr.msk.bf16.vlgmr.msra.gmra.mxu0 %vm1069_vm4, %v1653_v38  ;;  %v2347_v38 = vld [vmem:[%s3595_s5 + $0x9] ss:$0 sm:$0xff] }
 0xa5f   : > { %2589 = vmatprep.mubr.msk.bf16.mxu0 %vm3005_vm0, %v3004_v0  ;;  %2580 = vmatpush3.bf16.msra.mxu1 %v2734_v47 }
 0xa60   : > { %2593 = vmatprep.subr.bf16.mxu1 %v3004_v0  ;;  %2586 = vmatpush3.bf16.msra.mxu0 %v2735_v18 }
 0xa61   : > { %2587 = vmatprep.subr.bf16.mxu0 %v3004_v0 }
 0xa64   : > { %2588 = vmatpush3.bf16.msra.mxu0 %v2736_v19 }
 0xaae   : > { %v1695_v41 = vpop.f32.mrf.mxu1 }
 0xab0   : > { %v2557_v42 = vpop.f32.mrf.mxu1 }
 0xab2   : > { %v1698_v43 = vpop.f32.mrf.mxu1 }
 0xab4   : > { %v2558_v44 = vpop.f32.mrf.mxu1 }
 0xb16   : > { %v1738_v48 = vpop.f32.mrf.mxu0 }
 0xb17   : > { %1831 = vrot.lane.b32.xlu1 %v1738_v48, %s3009_s28  ;;  %s2921_s28 = sshll.u32 %s3012_s23, 4  ;;  %s2922_s28 = int_to_ptr.vmem [resolvable:$false] %s2921_s28 }
 0xb18   : > { %v2563_v49 = vpop.f32.mrf.mxu0  ;;  %s2923_s25 = scalar_lea.vmem %s2922_s28, 256  ;;  %p2924_p1 = scmp.lt.s32.totalorder %s2126_s12, %s2922_s28 }
 0xb19   : > { %p2925_p4 = scmp.lt.s32.totalorder %s2923_s25, %s2917_s13 }
 0xb1a   : > { %v1741_v50 = vpop.f32.mrf.mxu0  ;;  %v1781_v51 = vpop.f32.mrf.mxu1 }
 0xb1b   : > { %1835 = vrot.lane.b32.xlu0 %v1781_v51, %s3010_s20  ;;  %p2926_p6 = por %p2925_p4, %p2924_p1 }
 0xb1c   : > { %v2564_v52 = vpop.f32.mrf.mxu0  ;;  %v2569_v53 = vpop.f32.mrf.mxu1 }
 0xb1d   : > { %p2927_p8 = pnand %p2926_p6, %p2920_p9 }
 0xb1e   : > { %v1784_v54 = vpop.f32.mrf.mxu1  ;;  %v1824_v55 = vpop.f32.mrf.mxu0 }
 0xb1f   : > { %1839 = vrot.lane.b32.xlu1 %v1824_v55, %s3011_s30 }
 0xb20   : > { %v2570_v56 = vpop.f32.mrf.mxu1  ;;  %v2575_v57 = vpop.f32.mrf.mxu0 }
 0xb21   : > { %v2353_v57 = vld [vmem:[%s3595_s5 + $0xe] ss:$0 sm:$0xff] }
 0xb22   : > { %v1827_v58 = vpop.f32.mrf.mxu0 }
 0xb24   : > { %v2576_v59 = vpop.f32.mrf.mxu0 }
 0xb25   : > { %v2354_v59 = vld [vmem:[%s3595_s5 + $0xf] ss:$0 sm:$0xff] }
 0xb89   : > { %v1832_v60 = vpop.permute.xlu1 %1831 }
 0xb8a   : > { %v1842_v62 = vsel %vm634_vm2, %v1695_v41, %v1832_v60 }
 0xb8d   : > { %v1836_v61 = vpop.permute.xlu0 %1835 }
 0xb8e   : > { %v1843_v63 = vsel %vm1069_vm4, %v1842_v62, %v1836_v61 }
 0xb91   : > { %v1840_v1 = vpop.permute.xlu1 %1839 }
 0xb92   : > { %v1844_v2 = vsel %vm1071_vm5, %v1843_v63, %v1840_v1 }
 0xb93   : > { %v1845_v3 = vpack.c.bf16 %v1844_v2, %v1844_v2 }
 0xb95   : > { %2582 = vmatmul.mubr.msk.bf16.vlgmr.msra.gmra.mxu1 %vm426_vm1, %v1845_v3 }
 0xb96   : > { %2601 = vmatprep.mubr.msk.bf16.mxu1 %vm3005_vm0, %v3004_v0  ;;  %2594 = vmatpush3.bf16.msra.mxu1 %v2737_v20 }
 0xb97   : > { %2595 = vmatprep.subr.bf16.mxu1 %v3004_v0 }
 0xc55   : > { %v1904_v6 = vpop.f32.mrf.mxu1 }
 0xc56   : > { %v1905_v7 = vadd.f32 %v2337_v4, %v1904_v6 }
 0xc57   : > { %v2583_v8 = vpop.f32.mrf.mxu1 }
 0xc58   : > { %v1910_v9 = vadd.f32 %v1905_v7, %v3437_v46  ;;  %v2738_v46 = vld [vmem:[#allocation10 + $0xa0] sm:$0xff]  }
 0xc59   : > { %v1907_v10 = vpop.f32.mrf.mxu1  ;;  %2596 = vmatpush3.bf16.msra.mxu1 %v2738_v46 }
 0xc5a   : > { %v1911_v11 = vsel %vm426_vm1, %v1910_v9, 0.0  ;;  %2597 = vmatprep.subr.bf16.mxu1 %v3004_v0 }
 0xc5b   : > { %1912 = vadd.xlane.f32.xlu0 %v1911_v11  ;;  %v2584_v12 = vpop.f32.mrf.mxu1 }
 0xc5d   : > { %2598 = vmatpush3.bf16.msra.mxu1 %v2739_v30 }
 0xc5e   : > { %2599 = vmatprep.subr.bf16.mxu1 %v3004_v0 }
 0xc61   : > { %2600 = vmatpush3.bf16.msra.mxu1 %v2740_v31 }
 0xce4   : > { %v1913_v13 = vpop.xlane.xlu0 %1912 }
 0xce5   : > { %v1914_v14 = vmul.f32 0.03125, %v1913_v13 }
 0xce7   : > { %v1915_v15 = vsub.f32 %v1910_v9, %v1914_v14 }
 0xce9   : > { %v1916_v16 = vmul.f32 %v1915_v15, %v1915_v15 }
 0xceb   : > { %v1917_v17 = vsel %vm426_vm1, %v1916_v16, 0.0 }
 0xcec   : > { %1918 = vadd.xlane.f32.xlu1 %v1917_v17 }
 0xd75   : > { %v1919_v21 = vpop.xlane.xlu1 %1918 }
 0xd76   : > { %v1920_v22 = vmul.f32 0.03125, %v1919_v21 }
 0xd78   : > { %v1921_v23 = vadd.f32 1e-05, %v1920_v22 }
 0xd7a   : > { %2775 = vrsqrt.f32 %v1921_v23 }
 0xd87   : > { %v2776_v24 = vpop.eup %2775 }
 0xd88   : > { %v1923_v26 = vmul.f32 %v2776_v24, %v1915_v15 }
 0xd8a   : > { %v1929_v27 = vmul.f32 %v2341_v25, %v1923_v26 }
 0xd8c   : > { %v1935_v28 = vadd.f32 %v2342_v5, %v1929_v27 }
 0xd8e   : > { %v1936_v29 = vpack.c.bf16 %v1935_v28, %v1935_v28 }
 0xd90   : > { %2590 = vmatmul.mubr.msk.bf16.vlgmr.msra.gmra.mxu0 %vm426_vm1, %v1936_v29 }
 0xe50   : > { %v1995_v33 = vpop.f32.mrf.mxu0 }
 0xe51   : > { %v1996_v34 = vadd.f32 %v2343_v32, %v1995_v33 }
 0xe52   : > { %v2591_v35 = vpop.f32.mrf.mxu0 }
 0xe53   : > { %v2001_v36 = vmax.f32 %v1996_v34, 0.0 }
 0xe54   : > { %v1998_v37 = vpop.f32.mrf.mxu0 }
 0xe55   : > { %v2002_v39 = vpack.c.bf16 %v2001_v36, %v2001_v36 }
 0xe56   : > { %v2592_v40 = vpop.f32.mrf.mxu0 }
 0xe57   : > { %2602 = vmatmul.mubr.msk.bf16.vlgmr.msra.gmra.mxu1 %vm2040_vm6, %v2002_v39 }
 0xf17   : > { %v2078_v0 = vpop.f32.mrf.mxu1 }
 0xf18   : > { %v2079_v41 = vadd.f32 %v2347_v38, %v2078_v0 }
 0xf19   : > { %v2603_v42 = vpop.f32.mrf.mxu1 }
 0xf1a   : > { %v2084_v43 = vadd.f32 %v2079_v41, %v1935_v28 }
 0xf1b   : > { %v2081_v44 = vpop.f32.mrf.mxu1 }
 0xf1c   : > { %v2085_v45 = vsel %vm426_vm1, %v2084_v43, 0.0 }
 0xf1d   : > { %2086 = vadd.xlane.f32.xlu0 %v2085_v45  ;;  %v2604_v47 = vpop.f32.mrf.mxu1 }
 0xfa6   : > { %v2087_v48 = vpop.xlane.xlu0 %2086 }
 0xfa7   : > { %v2088_v49 = vmul.f32 0.03125, %v2087_v48 }
 0xfa9   : > { %v2089_v50 = vsub.f32 %v2084_v43, %v2088_v49 }
 0xfab   : > { %v2090_v51 = vmul.f32 %v2089_v50, %v2089_v50 }
 0xfad   : > { %v2091_v52 = vsel %vm426_vm1, %v2090_v51, 0.0 }
 0xfae   : > { %2092 = vadd.xlane.f32.xlu0 %v2091_v52 }
0x1037   : > { %v2093_v53 = vpop.xlane.xlu0 %2092 }
0x1038   : > { %v2094_v54 = vmul.f32 0.03125, %v2093_v53 }
0x103a   : > { %v2095_v55 = vadd.f32 1e-05, %v2094_v54 }
0x103c   : > { %2777 = vrsqrt.f32 %v2095_v55 }
0x1049   : > { %v2778_v56 = vpop.eup %2777 }
0x104a   : > { %v2097_v58 = vmul.f32 %v2778_v56, %v2089_v50 }
0x104c   : > { %v2103_v60 = vmul.f32 %v2353_v57, %v2097_v58 }
0x104e   : > { %v2109_v61 = vadd.f32 %v2354_v59, %v2103_v60 }
0x1050   : > { %2110 = vst.msk [vmem:[%s394_s9] sm:$0xff] %vm426_vm1, %v2109_v61 }
0x1051   : > { %2930 = shalt.err (!%p2927_p8)
}
0x1052   : > { %s2931_s16 = scalar_lea.hbm %s2123_s17, 128  ;;  %s2935_s30 = scalar_lea.hbm %s3596_s6, 256 }
0x1053   : > { %p2932_p3 = scmp.ne.s32.totalorder %s2123_s17, %s2931_s16  ;;  %p2936_p10 = scmp.lt.s32.totalorder %s2123_s17, %s3596_s6 }
0x1054   : > { %p2937_p11 = scmp.lt.s32.totalorder %s2935_s30, %s2931_s16 }
0x1055   : > { %p2933_p2 = pnand %p2932_p3, %p3635_p0 }
0x1056   : > { %p2938_p12 = por %p2937_p11, %p2936_p10 }
0x1057   : > { %p2934_p7 = pneg %p2933_p2 }
0x1059   : > { %p2939_p13 = pnand %p2938_p12, %p2934_p7 }
0x105b   : > { %2942 = shalt.err (!%p2939_p13)
}
0x105c   : > { %2617 = dma.vmem_to_hbm [thread:$0]  (%p3635_p0), %s2126_s12, 128, %s2123_s17, %s2112_s7  }
0x105d PF: > { %s3636_s26 = sld [smem:[#allocation18_spill]]  ;;  %s2137_s19 = sand.u32 1, %s2981_s21  }
0x105e   : > { %p3638_p9 = scmp.ge.s32.totalorder %s2993_s24, 2  ;;  %s2138_s8 = scalar_lea.sflag [#allocation4], %s2137_s19 }
0x1063   : > { %p3637_p5 = scmp.ne.s32.totalorder %s3636_s26, 0 }
0x1065   : > { %p2637_p1 = pnand %p3638_p9, %p3637_p5 }
0x1067   : > { %p2638_p4 = pneg %p2637_p1 }
0x1069   : > { %2976 = dma.done.wait (%p2638_p4), %s2138_s8, 128  }
0x106a   : > { %2978 = vsyncadd (%p2638_p4), %s2138_s8, 4294967168  ;;  %s3639_s24 = sld [smem:[#allocation19_spill]]  ;;  %s3642_s21 = smov %s2985_s22 }
0x106b   : > { %s3640_s10 = sld [smem:[#allocation17_spill]] }
0x106c   : > { %s3641_s23 = sld [smem:[#allocation20_spill]] }
0x1070   : > { %p25_p6 = scmp.ge.s32.totalorder %s3639_s24, 4  }
0x1071   : > { %s3643_s22 = smov %s3640_s10 }
0x1072   :  { %27 = sbr.rel (!%p25_p6) target bundleno = 12 (0xc), region = 130 }
0x1077   :  { %2143 = vsyncpa [#allocation3], 1 }
0x1078   :  { %2145 = vsyncpa [#allocation3 + $0x1], 1 }
0x1079   :  { %2146 = vsyncpa [#allocation6], 1 }
0x107a   :  { %2148 = vsyncpa [#allocation6 + $0x1], 1 }
0x107b   :  { %2149 = vsyncpa [#allocation9], 1 }
0x107c   :  { %2151 = vsyncpa [#allocation9 + $0x1], 1 }
0x107d   :  { %2152 = vsyncpa [#allocation4], 1 }
0x107e   :  { %2154 = vsyncpa [#allocation4 + $0x1], 1 }

</bundles_post_ra>
